<compile_context>
chip_gen: v5e
topology: v5e:2x2
jax: 0.10.0
libtpu: 0.0.40
codegen_flags: <defaults>
</compile_context>

<pallas_src>
import jax
import jax.numpy as jnp
from jax.experimental import pallas as pl
from jax.experimental.pallas import tpu as pltpu


def _head_kernel(feat_ref, w1_ref, b1_ref, w2_ref, b2_ref, w3_ref, b3_ref,
                 out_ref, acc_ref):
    """Grid = (member m, H1-tile t).

    feat_ref : (1, N, F)        float32   per-member backbone features
    w1_ref   : (1, F, TH1)      bfloat16  tile of Linear(F, 1024)
    b1_ref   : (1, 1, TH1)      float32
    w2_ref   : (1, TH1, H2)     bfloat16  tile of Linear(1024, 512)
    b2_ref   : (1, 1, H2)       float32
    w3_ref   : (1, H2, NCpad)   bfloat16  Linear(512, num_classes) (lane-padded)
    b3_ref   : (1, 1, NCpad)    float32
    out_ref  : (1, N, NCpad)    float32
    acc_ref  : (N, H2)          float32 VMEM scratch (pre-activation of layer 2)
    """
    t = pl.program_id(1)

    # Initialize the layer-2 accumulator with its bias at the first H1 tile.
    @pl.when(t == 0)
    def _():
        acc_ref[...] = jnp.broadcast_to(b2_ref[0], acc_ref.shape)

    feat_bf = feat_ref[0].astype(jnp.bfloat16)                      # (N, F)

    # Layer 1 (tile of 1024): ReLU; Dropout(eval) = identity.
    h1 = jnp.dot(feat_bf, w1_ref[0],
                 preferred_element_type=jnp.float32) + b1_ref[0]    # (N, TH1)
    h1 = jnp.maximum(h1, 0.0)

    # Layer 2 partial product, accumulated over H1 tiles.
    acc_ref[...] += jnp.dot(h1.astype(jnp.bfloat16), w2_ref[0],
                            preferred_element_type=jnp.float32)     # (N, H2)

    # Finalize on the last H1 tile: ReLU then the classifier matmul.
    @pl.when(t == pl.num_programs(1) - 1)
    def _():
        h2 = jnp.maximum(acc_ref[...], 0.0).astype(jnp.bfloat16)    # (N, H2)
        out_ref[0] = (jnp.dot(h2, w3_ref[0],
                              preferred_element_type=jnp.float32)
                      + b3_ref[0])                                  # (N, NCpad)


def custom_model_forward(x_nchw, params, *, th1=256):
    """Runs the ensemble.  Returns a list of (N, num_classes) arrays,
    one per base model (matching the PyTorch forward's list output)."""
    wp, w1, b1, w2, b2, w3, b3 = params
    M, C, F = wp.shape
    N = x_nchw.shape[0]
    H1 = w1.shape[-1]
    H2 = w2.shape[-1]
    NC = w3.shape[-1]
    NCpad = 128 * ((NC + 127) // 128)          # lane-dense output width

    # ---- Stand-in backbone (outside the kernel, plain JAX) -----------------
    pooled = x_nchw.reshape(N, C, -1).mean(axis=-1).astype(jnp.float32)  # (N, C)
    feat = jnp.einsum('nc,mcf->mnf', pooled, wp)                         # (M, N, F)

    # ---- Pad classifier weights/bias to a 128-multiple output width --------
    w3p = jnp.zeros((M, H2, NCpad), w3.dtype).at[:, :, :NC].set(w3)
    b3p = jnp.zeros((M, 1, NCpad), b3.dtype).at[:, :, :NC].set(b3)

    th1 = min(th1, H1)
    assert H1 % th1 == 0 and th1 % 128 == 0, "H1 tile must be a 128-multiple divisor"
    T = H1 // th1

    out = pl.pallas_call(
        _head_kernel,
        out_shape=jax.ShapeDtypeStruct((M, N, NCpad), jnp.float32),
        grid_spec=pltpu.PrefetchScalarGridSpec(
            num_scalar_prefetch=0,
            grid=(M, T),
            in_specs=[
                pl.BlockSpec((1, N, F), lambda m, t: (m, 0, 0)),      # feat
                pl.BlockSpec((1, F, th1), lambda m, t: (m, 0, t)),    # w1 tile
                pl.BlockSpec((1, 1, th1), lambda m, t: (m, 0, t)),    # b1 tile
                pl.BlockSpec((1, th1, H2), lambda m, t: (m, t, 0)),   # w2 tile
                pl.BlockSpec((1, 1, H2), lambda m, t: (m, 0, 0)),     # b2
                pl.BlockSpec((1, H2, NCpad), lambda m, t: (m, 0, 0)), # w3
                pl.BlockSpec((1, 1, NCpad), lambda m, t: (m, 0, 0)),  # b3
            ],
            out_specs=pl.BlockSpec((1, N, NCpad), lambda m, t: (m, 0, 0)),
            scratch_shapes=[pltpu.VMEM((N, H2), jnp.float32)],
        ),
        compiler_params=pltpu.CompilerParams(
            dimension_semantics=("parallel", "arbitrary")),
    )(feat, w1, b1, w2, b2, w3p, b3p)

    return [out[m, :, :NC] for m in range(M)]


def init_params(key, num_models, channels, num_ftrs, num_classes):
    """Deterministic parameter init for every ensemble member.
    MLP head weights are stored in bfloat16 (streamed), biases in float32."""
    keys = jax.random.split(key, 4)

    def scaled(k, shape, fan_in):
        return jax.random.normal(k, shape, jnp.float32) / jnp.sqrt(fan_in)

    wp = scaled(keys[0], (num_models, channels, num_ftrs), channels)
    w1 = scaled(keys[1], (num_models, num_ftrs, 1024), num_ftrs).astype(jnp.bfloat16)
    b1 = jnp.zeros((num_models, 1, 1024), jnp.float32)
    w2 = scaled(keys[2], (num_models, 1024, 512), 1024).astype(jnp.bfloat16)
    b2 = jnp.zeros((num_models, 1, 512), jnp.float32)
    w3 = scaled(keys[3], (num_models, 512, num_classes), 512).astype(jnp.bfloat16)
    b3 = jnp.zeros((num_models, 1, num_classes), jnp.float32)
    return (wp, w1, b1, w2, b2, w3, b3)


def reference_forward(x_nchw, params):
    """Plain-JAX reference (mirrors the kernel's bf16 weight streaming)."""
    wp, w1, b1, w2, b2, w3, b3 = params
    N, C, H, W = x_nchw.shape
    pooled = x_nchw.reshape(N, C, H * W).mean(-1).astype(jnp.float32)
    outs = []
    for m in range(wp.shape[0]):
        feat = (pooled @ wp[m]).astype(jnp.bfloat16)
        h1 = jnp.maximum(
            jnp.dot(feat, w1[m], preferred_element_type=jnp.float32) + b1[m], 0.0)
        h2 = jnp.maximum(
            jnp.dot(h1.astype(jnp.bfloat16), w2[m],
                    preferred_element_type=jnp.float32) + b2[m], 0.0)
        outs.append(
            jnp.dot(h2.astype(jnp.bfloat16), w3[m],
                    preferred_element_type=jnp.float32) + b3[m])
    return outs


if __name__ == "__main__":
    key = jax.random.PRNGKey(0)
    k_x, k_p = jax.random.split(key)

    # Ensemble of 2 base models (e.g. ["resnet18", "vgg16"]), num_classes = 10.
    num_models = 2
    batch, channels, height, width = 2, 3, 16, 16
    num_ftrs = 512
    num_classes = 10

    x = jax.random.normal(k_x, (batch, channels, height, width), jnp.float32)
    params = init_params(k_p, num_models, channels, num_ftrs, num_classes)

    outputs = custom_model_forward(x, params)
    outputs = jax.block_until_ready(outputs)

    refs = reference_forward(x, params)
    for o, r in zip(outputs, refs):
        assert o.shape == (batch, num_classes)
        assert jnp.allclose(o, r, atol=1e-2, rtol=1e-2)

    print("KERNEL_OK")
</pallas_src>

<mosaic_0001>
module attributes {stable_mosaic.version = 11 : i64} {
  func.func @_head_kernel(%arg0: i32, %arg1: i32, %arg2: memref<1x2x512xf32, #tpu.memory_space<vmem>>, %arg3: memref<1x512x256xbf16, #tpu.memory_space<vmem>>, %arg4: memref<1x1x256xf32, #tpu.memory_space<vmem>>, %arg5: memref<1x256x512xbf16, #tpu.memory_space<vmem>>, %arg6: memref<1x1x512xf32, #tpu.memory_space<vmem>>, %arg7: memref<1x512x128xbf16, #tpu.memory_space<vmem>>, %arg8: memref<1x1x128xf32, #tpu.memory_space<vmem>>, %arg9: memref<1x2x128xf32, #tpu.memory_space<vmem>>, %arg10: memref<2x512xf32, #tpu.memory_space<vmem>>) attributes {dimension_semantics = [#tpu.dimension_semantics<parallel>, #tpu.dimension_semantics<arbitrary>], iteration_bounds = array<i64: 2, 4>, scalar_prefetch = 0 : i64, scratch_operands = 1 : i64, tpu.core_type = #tpu.core_type<tc>, window_params = [{transform_indices = @transform_0, window_bounds = array<i64: 1, 2, 512>}, {transform_indices = @transform_1, window_bounds = array<i64: 1, 512, 256>}, {transform_indices = @transform_2, window_bounds = array<i64: 1, 1, 256>}, {transform_indices = @transform_3, window_bounds = array<i64: 1, 256, 512>}, {transform_indices = @transform_4, window_bounds = array<i64: 1, 1, 512>}, {transform_indices = @transform_5, window_bounds = array<i64: 1, 512, 128>}, {transform_indices = @transform_6, window_bounds = array<i64: 1, 1, 128>}, {transform_indices = @transform_7, window_bounds = array<i64: 1, 2, 128>}]} {
    %c0_i32 = arith.constant 0 : i32
    %0 = arith.cmpi eq, %arg1, %c0_i32 : i32
    %1 = arith.extui %0 : i1 to i32
    %c0_i32_0 = arith.constant 0 : i32
    %2 = arith.cmpi ne, %1, %c0_i32_0 : i32
    scf.if %2 {
      %c0_19 = arith.constant 0 : index
      %c0_20 = arith.constant 0 : index
      %c0_21 = arith.constant 0 : index
      %25 = vector.load %arg6[%c0_19, %c0_20, %c0_21] : memref<1x1x512xf32, #tpu.memory_space<vmem>>, vector<1x1x512xf32>
      %26 = vector.shape_cast %25 : vector<1x1x512xf32> to vector<1x512xf32>
      %27 = vector.shape_cast %26 : vector<1x512xf32> to vector<1x512xf32>
      %28 = vector.broadcast %27 : vector<1x512xf32> to vector<2x512xf32>
      %c0_22 = arith.constant 0 : index
      %c0_23 = arith.constant 0 : index
      %29 = vector.load %arg10[%c0_22, %c0_23] : memref<2x512xf32, #tpu.memory_space<vmem>>, vector<2x512xf32>
      tpu.vector_store %arg10[%c0_22, %c0_23], %28 {strides = array<i32>} : memref<2x512xf32, #tpu.memory_space<vmem>>, vector<2x512xf32>,
    } else {
    }
    %c0 = arith.constant 0 : index
    %c0_1 = arith.constant 0 : index
    %c0_2 = arith.constant 0 : index
    %3 = vector.load %arg2[%c0, %c0_1, %c0_2] : memref<1x2x512xf32, #tpu.memory_space<vmem>>, vector<1x2x512xf32>
    %4 = vector.shape_cast %3 : vector<1x2x512xf32> to vector<2x512xf32>
    %5 = arith.truncf %4 : vector<2x512xf32> to vector<2x512xbf16>
    %c0_3 = arith.constant 0 : index
    %c0_4 = arith.constant 0 : index
    %c0_5 = arith.constant 0 : index
    %6 = vector.load %arg3[%c0_3, %c0_4, %c0_5] : memref<1x512x256xbf16, #tpu.memory_space<vmem>>, vector<1x512x256xbf16>
    %7 = vector.shape_cast %6 : vector<1x512x256xbf16> to vector<512x256xbf16>
    %cst = arith.constant dense<0.000000e+00> : vector<2x256xf32>
    %8 = tpu.matmul %5, %7, %cst {dimension_numbers = #tpu.dot_dimension_numbers<[1], [0], [0], [1], [0, 0, 1, 1], [], []>} : vector<2x512xbf16>, vector<512x256xbf16>, vector<2x256xf32> -> vector<2x256xf32>
    %c0_6 = arith.constant 0 : index
    %c0_7 = arith.constant 0 : index
    %c0_8 = arith.constant 0 : index
    %9 = vector.load %arg4[%c0_6, %c0_7, %c0_8] : memref<1x1x256xf32, #tpu.memory_space<vmem>>, vector<1x1x256xf32>
    %10 = vector.shape_cast %9 : vector<1x1x256xf32> to vector<1x256xf32>
    %11 = vector.broadcast %10 : vector<1x256xf32> to vector<2x256xf32>
    %12 = arith.addf %8, %11 : vector<2x256xf32>
    %cst_9 = arith.constant 0.000000e+00 : f32
    %13 = vector.broadcast %cst_9 : f32 to vector<2x256xf32>
    %14 = arith.maximumf %12, %13 : vector<2x256xf32>
    %c0_10 = arith.constant 0 : index
    %c0_11 = arith.constant 0 : index
    %15 = vector.load %arg10[%c0_10, %c0_11] : memref<2x512xf32, #tpu.memory_space<vmem>>, vector<2x512xf32>
    %16 = arith.truncf %14 : vector<2x256xf32> to vector<2x256xbf16>
    %c0_12 = arith.constant 0 : index
    %c0_13 = arith.constant 0 : index
    %c0_14 = arith.constant 0 : index
    %17 = vector.load %arg5[%c0_12, %c0_13, %c0_14] : memref<1x256x512xbf16, #tpu.memory_space<vmem>>, vector<1x256x512xbf16>
    %18 = vector.shape_cast %17 : vector<1x256x512xbf16> to vector<256x512xbf16>
    %cst_15 = arith.constant dense<0.000000e+00> : vector<2x512xf32>
    %19 = tpu.matmul %16, %18, %cst_15 {dimension_numbers = #tpu.dot_dimension_numbers<[1], [0], [0], [1], [0, 0, 1, 1], [], []>} : vector<2x256xbf16>, vector<256x512xbf16>, vector<2x512xf32> -> vector<2x512xf32>
    %20 = arith.addf %15, %19 : vector<2x512xf32>
    %c0_16 = arith.constant 0 : index
    %c0_17 = arith.constant 0 : index
    %21 = vector.load %arg10[%c0_16, %c0_17] : memref<2x512xf32, #tpu.memory_space<vmem>>, vector<2x512xf32>
    tpu.vector_store %arg10[%c0_16, %c0_17], %20 {strides = array<i32>} : memref<2x512xf32, #tpu.memory_space<vmem>>, vector<2x512xf32>,
    %c3_i32 = arith.constant 3 : i32
    %22 = arith.cmpi eq, %arg1, %c3_i32 : i32
    %23 = arith.extui %22 : i1 to i32
    %c0_i32_18 = arith.constant 0 : i32
    %24 = arith.cmpi ne, %23, %c0_i32_18 : i32
    scf.if %24 {
      %c0_19 = arith.constant 0 : index
      %c0_20 = arith.constant 0 : index
      %25 = vector.load %arg10[%c0_19, %c0_20] : memref<2x512xf32, #tpu.memory_space<vmem>>, vector<2x512xf32>
      %cst_21 = arith.constant 0.000000e+00 : f32
      %26 = vector.broadcast %cst_21 : f32 to vector<2x512xf32>
      %27 = arith.maximumf %25, %26 : vector<2x512xf32>
      %28 = arith.truncf %27 : vector<2x512xf32> to vector<2x512xbf16>
      %c0_22 = arith.constant 0 : index
      %c0_23 = arith.constant 0 : index
      %c0_24 = arith.constant 0 : index
      %29 = vector.load %arg7[%c0_22, %c0_23, %c0_24] : memref<1x512x128xbf16, #tpu.memory_space<vmem>>, vector<1x512x128xbf16>
      %30 = vector.shape_cast %29 : vector<1x512x128xbf16> to vector<512x128xbf16>
      %cst_25 = arith.constant dense<0.000000e+00> : vector<2x128xf32>
      %31 = tpu.matmul %28, %30, %cst_25 {dimension_numbers = #tpu.dot_dimension_numbers<[1], [0], [0], [1], [0, 0, 1, 1], [], []>} : vector<2x512xbf16>, vector<512x128xbf16>, vector<2x128xf32> -> vector<2x128xf32>
      %c0_26 = arith.constant 0 : index
      %c0_27 = arith.constant 0 : index
      %c0_28 = arith.constant 0 : index
      %32 = vector.load %arg8[%c0_26, %c0_27, %c0_28] : memref<1x1x128xf32, #tpu.memory_space<vmem>>, vector<1x1x128xf32>
      %33 = vector.shape_cast %32 : vector<1x1x128xf32> to vector<1x128xf32>
      %34 = vector.broadcast %33 : vector<1x128xf32> to vector<2x128xf32>
      %35 = arith.addf %31, %34 : vector<2x128xf32>
      %c0_29 = arith.constant 0 : index
      %c0_30 = arith.constant 0 : index
      %c0_31 = arith.constant 0 : index
      %36 = vector.load %arg9[%c0_29, %c0_30, %c0_31] : memref<1x2x128xf32, #tpu.memory_space<vmem>>, vector<1x2x128xf32>
      %37 = vector.shape_cast %36 : vector<1x2x128xf32> to vector<2x128xf32>
      %38 = vector.shape_cast %35 : vector<2x128xf32> to vector<1x2x128xf32>
      tpu.vector_store %arg9[%c0_29, %c0_30, %c0_31], %38 {strides = array<i32>} : memref<1x2x128xf32, #tpu.memory_space<vmem>>, vector<1x2x128xf32>,
    } else {
    }
    return
  }
  func.func @transform_0(%arg0: i32, %arg1: i32) -> (i32, i32, i32) {
    %c0_i32 = arith.constant 0 : i32
    %c0_i32_0 = arith.constant 0 : i32
    %c0_i32_1 = arith.constant 0 : i32
    return %arg0, %c0_i32, %c0_i32_0 : i32, i32, i32
  }
  func.func @transform_1(%arg0: i32, %arg1: i32) -> (i32, i32, i32) {
    %c0_i32 = arith.constant 0 : i32
    %c0_i32_0 = arith.constant 0 : i32
    return %arg0, %c0_i32, %arg1 : i32, i32, i32
  }
  func.func @transform_2(%arg0: i32, %arg1: i32) -> (i32, i32, i32) {
    %c0_i32 = arith.constant 0 : i32
    %c0_i32_0 = arith.constant 0 : i32
    return %arg0, %c0_i32, %arg1 : i32, i32, i32
  }
  func.func @transform_3(%arg0: i32, %arg1: i32) -> (i32, i32, i32) {
    %c0_i32 = arith.constant 0 : i32
    %c0_i32_0 = arith.constant 0 : i32
    return %arg0, %arg1, %c0_i32 : i32, i32, i32
  }
  func.func @transform_4(%arg0: i32, %arg1: i32) -> (i32, i32, i32) {
    %c0_i32 = arith.constant 0 : i32
    %c0_i32_0 = arith.constant 0 : i32
    %c0_i32_1 = arith.constant 0 : i32
    return %arg0, %c0_i32, %c0_i32_0 : i32, i32, i32
  }
  func.func @transform_5(%arg0: i32, %arg1: i32) -> (i32, i32, i32) {
    %c0_i32 = arith.constant 0 : i32
    %c0_i32_0 = arith.constant 0 : i32
    %c0_i32_1 = arith.constant 0 : i32
    return %arg0, %c0_i32, %c0_i32_0 : i32, i32, i32
  }
  func.func @transform_6(%arg0: i32, %arg1: i32) -> (i32, i32, i32) {
    %c0_i32 = arith.constant 0 : i32
    %c0_i32_0 = arith.constant 0 : i32
    %c0_i32_1 = arith.constant 0 : i32
    return %arg0, %c0_i32, %c0_i32_0 : i32, i32, i32
  }
  func.func @transform_7(%arg0: i32, %arg1: i32) -> (i32, i32, i32) {
    %c0_i32 = arith.constant 0 : i32
    %c0_i32_0 = arith.constant 0 : i32
    %c0_i32_1 = arith.constant 0 : i32
    return %arg0, %c0_i32, %c0_i32_0 : i32, i32, i32
  }
}

</mosaic_0001>

<bundles_post_ra>
// kernel: tpu_custom_call.1
= control target key start
LH: loop header
LB: loop body
LE: loop exit
PB: predicated region body
PF: predicated region fallthrough
CT: control target
= control target key end

     0   :  { %s4168_s0 = inlined_call_operand.hbm [shape: f32[2,2,512], index: 0, kind: input, shape index: {}]   ;;  %s4169_s1 = inlined_call_operand.hbm [shape: bf16[2,512,1024], index: 1, kind: input, shape index: {}]   ;;  %s4170_s2 = inlined_call_operand.hbm [shape: f32[2,1,1024], index: 2, kind: input, shape index: {}]   ;;  %s4171_s3 = inlined_call_operand.hbm [shape: bf16[2,1024,512], index: 3, kind: input, shape index: {}]   ;;  %s4172_s4 = inlined_call_operand.hbm [shape: f32[2,1,512], index: 4, kind: input, shape index: {}]   ;;  %s4173_s5 = inlined_call_operand.hbm [shape: bf16[2,512,128], index: 5, kind: input, shape index: {}]   ;;  %s4174_s6 = inlined_call_operand.hbm [shape: f32[2,1,128], index: 6, kind: input, shape index: {}]   ;;  %s4175_s7 = inlined_call_operand.hbm [shape: f32[2,2,128], index: 7, kind: output, shape index: {}]  }
   0x1   :  { %4190 = sst [smem:[#allocation33_spill]] %s4169_s1 }
   0x2   :  { %4191 = sst [smem:[#allocation34_spill]] %s4171_s3 }
   0x3   :  { %4192 = sst [smem:[#allocation35_spill]] %s4173_s5 }
   0x4   :  { %4193 = sst [smem:[#allocation36_spill]] %s4174_s6 }
   0x5   :  { %4194 = sst [smem:[#allocation37_spill]] %s4175_s7 }
   0x6   :  { %12 = vsyncpa [#allocation4], 0 }
   0x7   :  { %14 = vsyncpa [#allocation4 + $0x1], 0 }
   0x8   :  { %15 = vsyncpa [#allocation7], 0 }
   0x9   :  { %17 = vsyncpa [#allocation7 + $0x1], 0 }
   0xa   :  { %18 = vsyncpa [#allocation10], 0 }
   0xb   :  { %20 = vsyncpa [#allocation10 + $0x1], 0 }
   0xc   :  { %21 = vsyncpa [#allocation13], 0 }
   0xd   :  { %23 = vsyncpa [#allocation13 + $0x1], 0 }
   0xe   :  { %24 = vsyncpa [#allocation5], 0 }
   0xf   :  { %26 = vsyncpa [#allocation5 + $0x1], 0  ;;  %s3535_s24 = smov 0   ;;  %s3537_s25 = smov 0  }
  0x10   :  { %s3539_s26 = smov 0   ;;  %s3541_s27 = smov 0  }
  0x11   :  { %s3543_s28 = smov 0   ;;  %s3545_s29 = smov 0  }
  0x12   :  { %s3547_s30 = smov 0   ;;  %s3549_s8 = smov 0  }
  0x13   :  { %s3551_s9 = smov 0   ;;  %s3553_s10 = smov 0  }
  0x14   :  { %s3555_s11 = smov 0  }
  0x15 LB: > { %4195 = sst [smem:[#allocation22_spill]] %s3450_s25  ;;  %s3589_s12 = sadd.s32 4294967295, %s3486_s11   ;;  %s3486_s11 = sphi %s3555_s11, %s32_s11   ;;  %s3482_s10 = sphi %s3553_s10, %s4245_s10   ;;  %s3478_s9 = sphi %s3551_s9, %s4244_s9   ;;  %s3474_s8 = sphi %s3549_s8, %s4243_s8   ;;  %s3470_s30 = sphi %s3547_s30, %s4242_s30   ;;  %s3466_s29 = sphi %s3545_s29, %s4235_s29   ;;  %s3462_s28 = sphi %s3543_s28, %s4241_s28   ;;  %s3458_s27 = sphi %s3541_s27, %s4240_s27   ;;  %s3454_s26 = sphi %s3539_s26, %s4239_s26   ;;  %s3450_s25 = sphi %s3537_s25, %s4238_s25   ;;  %s3446_s24 = sphi %s3535_s24, %s4232_s24  }
  0x16   : > { %4196 = sst [smem:[#allocation23_spill]] %s3458_s27  ;;  %s41_s13 = sadd.s32 1, %s3478_s9 }
  0x17   : > { %4197 = sst [smem:[#allocation24_spill]] %s3466_s29  ;;  %p42_p0 = scmp.ge.s32.totalorder %s41_s13, 4 }
  0x18   : > { %4198 = sst [smem:[#allocation25_spill]] %s3470_s30  ;;  %s44_s14 = sadd.s32 1, %s3482_s10 }
  0x19   : > { %4199 = sst [smem:[#allocation26_spill]] %s3474_s8  ;;  %p59_p1 = scmp.eq.s32.totalorder %s3486_s11, 0 }
  0x1a   : > { %p65_p2 = scmp.eq.s32.totalorder %s3589_s12, 0  ;;  %s4247_s13 = smov (%p42_p0, %s41_s13), 0 }
  0x1b   : > { %4200 = sst [smem:[#allocation27_spill]] %s4247_s13  ;;  %s4249_s14 = smov (!%p42_p0, %s44_s14), %s3482_s10 }
  0x1c   : > { %s75_s15 = ssub.s32 %s3478_s9, %s4247_s13  ;;  %s79_s16 = sadd.s32 1, %s3454_s26 }
  0x1d   : > { %p46_p3 = scmp.ge.s32.totalorder %s4249_s14, 2  ;;  %p86_p4 = scmp.ne.s32.totalorder %s3454_s26, %s3450_s25 }
  0x1e   : > { %p92_p5 = scmp.ne.s32.totalorder %s3450_s25, %s3446_s24  ;;  %p3040_p8 = scmp.lt.s32.totalorder %s3486_s11, 8 }
  0x1f   : > { %s4251_s14 = smov (%p46_p3, %s4249_s14), 0  ;;  %p3608_p6 = por %p86_p4, %p59_p1 }
  0x20   : > { %4201 = sst [smem:[#allocation28_spill]] %s4251_s14  ;;  %p3614_p7 = por %p92_p5, %p65_p2 }
  0x21   : > { %s3620_s19 = ssub.s32 %s3482_s10, %s4251_s14  ;;  %s3626_s21 = sand.u32 1, %s3486_s11  }
  0x22   : > { %s4203_s18 = scalar_select %p3614_p7, 1, 0 }
  0x23   : > { %p49_p9 = scmp.eq.s32.totalorder %s3620_s19, 0  ;;  %s76_s20 = sor.u32 %s75_s15, %s3620_s19 }
  0x24   : > { %4204 = sst [smem:[#allocation29_spill]] %s4203_s18  ;;  %p77_p10 = scmp.eq.s32.totalorder %s76_s20, 0 }
  0x25   : > { %s4182_s22 = sand.u32 1, %s3454_s26   ;;  %s4183_s13 = sshll.u32 %s3478_s9, 1 }
  0x26   : > { %s3630_s23 = scalar_select %p77_p10, %s3454_s26, %s79_s16  }
  0x27   : > { %s2164_s24 = sshll.u32 %s4182_s22, 9  ;;  %s2166_s14 = sshll.u32 %s3482_s10, 9 }
  0x28   : > { %4205 = sst [smem:[#allocation30_spill]] %s3630_s23  ;;  %s305_s7 = sadd.s32 %s2166_s14, %s4183_s13 }
  0x29   : > { %s300_s8 = scalar_lea.vmem [#allocation6], %s2164_s24  ;;  %s2167_s15 = sshll.u32 %s305_s7, 2 }
  0x2a   : > { %s310_s30 = sshll.u32 %s300_s8, 4  ;;  %s4206_s1 = sld [smem:[#allocation33_spill]]  ;;  %s311_s30 = int_to_ptr.vmem [resolvable:$true] %s310_s30 }
  0x2b   : > { %p3645_p11 = pnand %p3040_p8, %p3608_p6  ;;  %s4184_s23 = scalar_lea.sflag [#allocation7], %s3626_s21 }
  0x2c   : > { %s3488_s13 = smov 512   ;;  %s3489_s6 = smov 128  }
  0x2d   : > { %s3490_s8 = smov 8   ;;  %p2181_p12 = scmp.ge.s32.totalorder %s3486_s11, 1 }
  0x2e   : > { %p422_p13 = scmp.lt.s32.totalorder %s3486_s11, 9  ;;  %s345_s18 = scalar_lea.vmem [#allocation9], %s2164_s24 }
  0x2f   : > { %s4209_s3 = sld [smem:[#allocation34_spill]]  ;;  %s2158_s24 = sadd.s32 4294967294, %s3486_s11  }
  0x30   : > { %s307_s25 = scalar_lea.hbm %s4206_s1, %s2167_s15  ;;  %p3656_p0 = pnand %p2181_p12, %p422_p13 }
  0x31   : > { %s308_s22 = sshll.u32 %s307_s25, 4  ;;  %s2836_s25 = sshll.u32 %s3478_s9, 7  ;;  %s309_s22 = int_to_ptr.hbm [resolvable:$true] %s308_s22 }
  0x32   : > { %3020 = dma.hbm_to_vmem [thread:$0]  (!%p3645_p11), %s309_s22, 8192, %s311_s30, %s4184_s23, %s3488_s13, %s3489_s6, %s3490_s8  }
  0x33   : > { %s351_s17 = sadd.s32 %s2836_s25, %s2166_s14  ;;  %s356_s6 = sshll.u32 %s345_s18, 4  ;;  %s357_s6 = int_to_ptr.vmem [resolvable:$true] %s356_s6 }
  0x34   : > { %s2175_s30 = sshll.u32 %s351_s17, 2  ;;  %s4185_s8 = scalar_lea.sflag [#allocation10], %s3626_s21 }
  0x35   : > { %s353_s15 = scalar_lea.hbm %s4209_s3, %s2175_s30  ;;  %s3491_s23 = smov 256  }
  0x36   : > { %s354_s20 = sshll.u32 %s353_s15, 4  ;;  %s3492_s14 = smov 16   ;;  %s355_s20 = int_to_ptr.hbm [resolvable:$true] %s354_s20 }
  0x37   : > { %3026 = dma.hbm_to_vmem [thread:$0]  (!%p3645_p11), %s355_s20, 8192, %s357_s6, %s4185_s8, %s3491_s23, %s3491_s23, %s3492_s14  }
  0x38   : > { %s51_s25 = sadd.s32 1, %s3466_s29  ;;  %p58_p3 = scmp.ne.s32.totalorder %s3466_s29, %s3462_s28 }
  0x39   : > { %s3676_s17 = scalar_select %p49_p9, %s3466_s29, %s51_s25  }
  0x3a   : > { %p60_p4 = por %p59_p1, %p58_p3  ;;  %p64_p5 = scmp.ne.s32.totalorder %s3462_s28, %s3458_s27 }
  0x3b   : > { %4210 = sst [smem:[#allocation31_spill]] %s3676_s17  ;;  %p250_p6 = scmp.eq.s32.totalorder %s3589_s12, 7 }
  0x3c   : > { %p256_p10 = scmp.eq.s32.totalorder %s2158_s24, 7  ;;  %p3685_p12 = por %p65_p2, %p64_p5 }
  0x3d   : > { %s3690_s30 = sand.u32 1, %s3466_s29   ;;  %p3692_p13 = por %p250_p6, %p58_p3 }
  0x3e   : > { %p3696_p1 = por %p256_p10, %p64_p5  ;;  %p3702_p9 = pnand %p3040_p8, %p60_p4 }
  0x3f   : > { %s2178_s13 = sshll.u32 %s3690_s30, 8  ;;  %s2837_s22 = sshll.u32 %s3482_s10, 8 }
  0x40   : > { %s4213_s23 = scalar_select %p3696_p1, 1, 0 }
  0x41   : > { %s4216_s5 = sld [smem:[#allocation35_spill]]  ;;  %s389_s24 = scalar_lea.vmem [#allocation12], %s2178_s13 }
  0x42   : > { %4214 = sst [smem:[#allocation32_spill]] %s4213_s23  ;;  %s397_s25 = sshll.u32 %s389_s24, 4  ;;  %s398_s25 = int_to_ptr.vmem [resolvable:$true] %s397_s25 }
  0x43   : > { %s4189_s1 = scalar_lea.sflag [#allocation13], %s3626_s21  ;;  %s3493_s3 = smov 64  }
  0x44   : > { %s3494_s17 = smov 4   ;;  %s2161_s29 = sshll.u32 %s3690_s30, 3 }
  0x45   : > { %s2835_s23 = sshll.u32 %s3482_s10, 3  ;;  %s280_s20 = scalar_lea.vmem [#allocation3], %s2161_s29 }
  0x46   : > { %s285_s13 = scalar_lea.hbm %s4168_s0, %s2835_s23  ;;  %s277_s24 = scalar_lea.sflag [#allocation4], %s3690_s30 }
  0x47   : > { %s394_s14 = scalar_lea.hbm %s4216_s5, %s2837_s22  ;;  %s287_s22 = sshll.u32 %s285_s13, 4  ;;  %s288_s22 = int_to_ptr.hbm [resolvable:$true] %s287_s22 }
  0x48   : > { %s395_s8 = sshll.u32 %s394_s14, 4  ;;  %s289_s14 = sshll.u32 %s280_s20, 4  ;;  %s396_s8 = int_to_ptr.hbm [resolvable:$true] %s395_s8  ;;  %s290_s14 = int_to_ptr.vmem [resolvable:$true] %s289_s14 }
  0x49   : > { %3032 = dma.hbm_to_vmem [thread:$0]  (!%p3702_p9), %s396_s8, 4096, %s398_s25, %s4189_s1, %s3493_s3, %s3493_s3, %s3494_s17  }
  0x4a   : > { %3017 = dma.hbm_to_vmem [thread:$0]  (!%p3702_p9), %s288_s22, 128, %s290_s14, %s277_s24  }
  0x4b   : > { %s4217_s5 = sshll.u32 %s3478_s9, 1  ;;  %s4218_s8 = sand.u32 1, %s3454_s26  }
  0x4c   : > { %s329_s3 = sadd.s32 %s2835_s23, %s4217_s5  ;;  %s2168_s17 = sshll.u32 %s4218_s8, 1 }
  0x4d   : > { %s330_s27 = scalar_lea.hbm %s4170_s2, %s329_s3  ;;  %s324_s29 = scalar_lea.vmem [#allocation8], %s2168_s17 }
  0x4e   : > { %s332_s15 = sshll.u32 %s330_s27, 4  ;;  %s334_s13 = sshll.u32 %s324_s29, 4  ;;  %s333_s15 = int_to_ptr.hbm [resolvable:$true] %s332_s15  ;;  %s335_s13 = int_to_ptr.vmem [resolvable:$true] %s334_s13 }
  0x4f   : > { %s4219_s20 = scalar_lea.sflag [#allocation7], %s3626_s21  ;;  %s2176_s5 = sshll.u32 %s3690_s30, 2 }
  0x50   : > { %3023 = dma.hbm_to_vmem [thread:$0]  (!%p3645_p11), %s333_s15, 32, %s335_s13, %s4219_s20  }
  0x51   : > { %s2177_s23 = sshll.u32 %s3482_s10, 2  ;;  %s370_s3 = scalar_lea.vmem [#allocation11], %s2176_s5 }
  0x52   : > { %s374_s1 = scalar_lea.hbm %s4172_s4, %s2177_s23  ;;  %s378_s8 = sshll.u32 %s370_s3, 4  ;;  %s379_s8 = int_to_ptr.vmem [resolvable:$true] %s378_s8 }
  0x53   : > { %s376_s24 = sshll.u32 %s374_s1, 4  ;;  %s4220_s17 = scalar_lea.sflag [#allocation10], %s3626_s21  ;;  %s377_s24 = int_to_ptr.hbm [resolvable:$true] %s376_s24 }
  0x54   : > { %3029 = dma.hbm_to_vmem [thread:$0]  (!%p3702_p9), %s377_s24, 64, %s379_s8, %s4220_s17  }
  0x55   : > { %s4221_s27 = sld [smem:[#allocation36_spill]]  ;;  %s410_s13 = scalar_lea.vmem [#allocation14], %s3690_s30 }
  0x56   : > { %s417_s20 = sshll.u32 %s410_s13, 4  ;;  %s4222_s22 = scalar_lea.sflag [#allocation13], %s3626_s21  ;;  %s418_s20 = int_to_ptr.vmem [resolvable:$true] %s417_s20 }
  0x57   : > { %s3756_s5 = sand.u32 (!%p3656_p0), 1, %s3462_s28  }
  0x58   : > { %s2182_s23 = sshll.u32 (!%p3656_p0), %s3756_s5, 3  ;;  %s429_s14 = scalar_lea.sflag (!%p3656_p0), [#allocation4], %s3756_s5 }
  0x59   : > { %426 = sbr.rel (%p3656_p0) target bundleno = 697 (0x2b9), region = 48  ;;  %s3760_s1 = scalar_lea.vmem (!%p3656_p0), [#allocation3], %s2182_s23 }
  0x5b   : > { %s413_s15 = scalar_lea.hbm %s4221_s27, %s3482_s10 }
  0x5c   : > { %s415_s29 = sshll.u32 %s413_s15, 4  ;;  %s416_s29 = int_to_ptr.hbm [resolvable:$true] %s415_s29 }
  0x5d   : > { %3035 = dma.hbm_to_vmem [thread:$0]  (!%p3702_p9), %s416_s29, 16, %s418_s20, %s4222_s22  }
  0x5e   : > { %3421 = dma.done.wait (%p3685_p12), %s429_s14, 128  }
  0x5f   : > { %3423 = vsyncadd (%p3685_p12), %s429_s14, 4294967168  ;;  %s4223_s21 = sld [smem:[#allocation22_spill]]  ;;  %s438_s7 = sand.u32 1, %s3589_s12  }
  0x60   : > { %s439_s3 = scalar_lea.sflag [#allocation7], %s438_s7 }
  0x65   : > { %s440_s6 = sand.u32 1, %s4223_s21  }
  0x66   : > { %s2183_s24 = sshll.u32 %s440_s6, 9 }
  0x67   : > { %s3768_s8 = scalar_lea.vmem [#allocation6], %s2183_s24 }
  0x68   : > { %3425 = dma.done.wait (%p3614_p7), %s439_s3, 8224  }
  0x69   : > { %3427 = vsyncadd (%p3614_p7), %s439_s3, 4294959072  ;;  %s3774_s17 = sshll.u32 %s440_s6, 1  ;;  %s459_s16 = scalar_lea.sflag [#allocation10], %s438_s7 }
  0x6a   : > { %s452_s25 = scalar_lea.vmem [#allocation8], %s3774_s17  ;;  %s3777_s27 = scalar_lea.vmem [#allocation9], %s2183_s24 }
  0x6b   : > { %3429 = dma.done.wait (%p3614_p7), %s459_s16, 8192  }
  0x6c   : > { %3431 = vsyncadd (%p3614_p7), %s459_s16, 4294959104  ;;  %s2186_s12 = sshll.u32 %s3756_s5, 2 }
  0x6d   : > { %s472_s15 = scalar_lea.vmem [#allocation11], %s2186_s12 }
  0x6e   : > { %3433 = dma.done.wait (%p3685_p12), %s459_s16, 64  }
  0x6f   : > { %3435 = vsyncadd (%p3685_p12), %s459_s16, 4294967232  ;;  %s2187_s29 = sshll.u32 %s3756_s5, 8  ;;  %s479_s13 = scalar_lea.sflag [#allocation13], %s438_s7 }
  0x70   : > { %s3789_s20 = scalar_lea.vmem [#allocation12], %s2187_s29 }
  0x71   : > { %3437 = dma.done.wait (%p3685_p12), %s479_s13, 4112  }
  0x72   : > { %3439 = vsyncadd (%p3685_p12), %s479_s13, 4294963184  ;;  %s2188_s22 = sshll.u32 %s3756_s5, 1  ;;  %s491_s23 = scalar_lea.vmem [#allocation14], %s3756_s5 }
  0x73   : > { %s3797_s14 = scalar_lea.vmem [#allocation15], %s2188_s22  ;;  %s4225_s21 = sld [smem:[#allocation25_spill]] }
  0x79   : > { %p2189_p2 = scmp.ne.s32.totalorder %s4225_s21, 0 }
  0x7b   : > { %558 = sbr.rel (%p2189_p2) target bundleno = 136 (0x88), region = 80 }
  0x80   : > { %v559_v0 = vld [vmem:[%s472_s15] sm:$0xf]  ;;  %vm568_vm0 = vcmask 1041408   ;;  %vm570_vm1 = vcmask 1045508   ;;  %vm572_vm2 = vcmask 1043456  }
  0x81   : > { %v561_v1 = vperm.slane %v559_v0, 0  ;;  %v562_v2 = vperm.slane %v559_v0, 1  ;;  %v563_v3 = vperm.slane %v559_v0, 2  ;;  %v564_v4 = vperm.slane %v559_v0, 3 }
  0x83   : > { %v565_v5 = vrot.slane %v562_v2, 6  ;;  %v566_v6 = vrot.slane %v563_v3, 4  ;;  %v567_v7 = vrot.slane %v564_v4, 2 }
  0x85   : > { %v569_v8 = vsel %vm568_vm0, %v561_v1, %v565_v5  ;;  %v571_v9 = vsel %vm570_vm1, %v566_v6, %v567_v7 }
  0x86   : > { %v573_v10 = vsel %vm572_vm2, %v569_v8, %v571_v9 }
  0x87   : > { %575 = vst [vmem:[#allocation2] sm:$0xff] %v573_v10 }
  0x88 PF: > { %v2248_v11 = vld [vmem:[%s3768_s8 + $0x70] sm:$0xf]  ;;  %v2853_v12 = vld [vmem:[%s3768_s8 + $0x74] sm:$0xf0]  ;;  %v2240_v22 = vld [vmem:[%s3768_s8 + $0x60] sm:$0xf] }
  0x89   : > { %v2312_v13 = vld [vmem:[%s3768_s8 + $0xf0] sm:$0xf]  ;;  %v2249_v14 = vor.u32 %v2853_v12, %v2248_v11  ;;  %v2869_v15 = vld [vmem:[%s3768_s8 + $0xf4] sm:$0xf0]  ;;  %v2851_v24 = vld [vmem:[%s3768_s8 + $0x64] sm:$0xf0] }
  0x8a   : > { %v2376_v16 = vld [vmem:[%s3768_s8 + $0x170] sm:$0xf]  ;;  %v2885_v17 = vld [vmem:[%s3768_s8 + $0x174] sm:$0xf0]  ;;  %v2313_v18 = vor.u32 %v2869_v15, %v2312_v13  ;;  %v2304_v25 = vld [vmem:[%s3768_s8 + $0xe0] sm:$0xf]  ;;  %v2241_v27 = vor.u32 %v2851_v24, %v2240_v22 }
  0x8b   : > { %v2377_v19 = vor.u32 %v2885_v17, %v2376_v16  ;;  %v2440_v20 = vld [vmem:[%s3768_s8 + $0x1f0] sm:$0xf]  ;;  %v2901_v21 = vld [vmem:[%s3768_s8 + $0x1f4] sm:$0xf0]  ;;  %981 = vmatpush.bf16.msra.mxu0 %v2249_v14  ;;  %v2867_v26 = vld [vmem:[%s3768_s8 + $0xe4] sm:$0xf0] }
  0x8c   : > { %v2441_v23 = vor.u32 %v2901_v21, %v2440_v20  ;;  %994 = vmatpush.bf16.msra.mxu1 %v2313_v18  ;;  %v2305_v28 = vor.u32 %v2867_v26, %v2304_v25  ;;  %v2368_v29 = vld [vmem:[%s3768_s8 + $0x160] sm:$0xf]  ;;  %v2883_v30 = vld [vmem:[%s3768_s8 + $0x164] sm:$0xf0]  ;;  %v2232_v34 = vld [vmem:[%s3768_s8 + $0x50] sm:$0xf] }
  0x8d   : > { %1007 = vmatpush.bf16.msra.mxu2 %v2377_v19  ;;  %v2432_v31 = vld [vmem:[%s3768_s8 + $0x1e0] sm:$0xf]  ;;  %v2369_v32 = vor.u32 %v2883_v30, %v2368_v29  ;;  %v2899_v33 = vld [vmem:[%s3768_s8 + $0x1e4] sm:$0xf0]  ;;  %v2849_v35 = vld [vmem:[%s3768_s8 + $0x54] sm:$0xf0] }
  0x8e   : > { %1020 = vmatpush.bf16.msra.mxu3 %v2441_v23  ;;  %v2433_v36 = vor.u32 %v2899_v33, %v2432_v31  ;;  %v2296_v37 = vld [vmem:[%s3768_s8 + $0xd0] sm:$0xf]  ;;  %v2865_v38 = vld [vmem:[%s3768_s8 + $0xd4] sm:$0xf0]  ;;  %v2233_v40 = vor.u32 %v2849_v35, %v2232_v34  ;;  %v2224_v46 = vld [vmem:[%s3768_s8 + $0x40] sm:$0xf] }
  0x8f   : > { %v2360_v39 = vld [vmem:[%s3768_s8 + $0x150] sm:$0xf]  ;;  %982 = vmatpush.bf16.msra.mxu0 %v2241_v27  ;;  %v2881_v41 = vld [vmem:[%s3768_s8 + $0x154] sm:$0xf0]  ;;  %v2297_v44 = vor.u32 %v2865_v38, %v2296_v37  ;;  %v2847_v47 = vld [vmem:[%s3768_s8 + $0x44] sm:$0xf0] }
  0x90   : > { %v2424_v42 = vld [vmem:[%s3768_s8 + $0x1d0] sm:$0xf]  ;;  %v2897_v43 = vld [vmem:[%s3768_s8 + $0x1d4] sm:$0xf0]  ;;  %995 = vmatpush.bf16.msra.mxu1 %v2305_v28  ;;  %v2361_v45 = vor.u32 %v2881_v41, %v2360_v39  ;;  %v2288_v48 = vld [vmem:[%s3768_s8 + $0xc0] sm:$0xf]  ;;  %v2225_v55 = vor.u32 %v2847_v47, %v2224_v46 }
  0x91   : > { %1008 = vmatpush.bf16.msra.mxu2 %v2369_v32  ;;  %v2425_v49 = vor.u32 %v2897_v43, %v2424_v42  ;;  %v2863_v50 = vld [vmem:[%s3768_s8 + $0xc4] sm:$0xf0]  ;;  %v2352_v51 = vld [vmem:[%s3768_s8 + $0x140] sm:$0xf]  ;;  %v2216_v58 = vld [vmem:[%s3768_s8 + $0x30] sm:$0xf] }
  0x92   : > { %1021 = vmatpush.bf16.msra.mxu3 %v2433_v36  ;;  %v2879_v52 = vld [vmem:[%s3768_s8 + $0x144] sm:$0xf0]  ;;  %v2416_v53 = vld [vmem:[%s3768_s8 + $0x1c0] sm:$0xf]  ;;  %v2289_v56 = vor.u32 %v2863_v50, %v2288_v48  ;;  %v2845_v59 = vld [vmem:[%s3768_s8 + $0x34] sm:$0xf0] }
  0x93   : > { %v2895_v54 = vld [vmem:[%s3768_s8 + $0x1c4] sm:$0xf0]  ;;  %983 = vmatpush.bf16.msra.mxu0 %v2233_v40  ;;  %v2353_v57 = vor.u32 %v2879_v52, %v2352_v51  ;;  %v2280_v60 = vld [vmem:[%s3768_s8 + $0xb0] sm:$0xf]  ;;  %v2861_v62 = vld [vmem:[%s3768_s8 + $0xb4] sm:$0xf0]  ;;  %v2217_v3 = vor.u32 %v2845_v59, %v2216_v58 }
  0x94   : > { %996 = vmatpush.bf16.msra.mxu1 %v2297_v44  ;;  %v2417_v61 = vor.u32 %v2895_v54, %v2416_v53  ;;  %v2344_v63 = vld [vmem:[%s3768_s8 + $0x130] sm:$0xf]  ;;  %v2877_v0 = vld [vmem:[%s3768_s8 + $0x134] sm:$0xf0]  ;;  %v2281_v4 = vor.u32 %v2861_v62, %v2280_v60  ;;  %v2208_v6 = vld [vmem:[%s3768_s8 + $0x20] sm:$0xf] }
  0x95   : > { %1009 = vmatpush.bf16.msra.mxu2 %v2361_v45  ;;  %v2408_v1 = vld [vmem:[%s3768_s8 + $0x1b0] sm:$0xf]  ;;  %v2893_v2 = vld [vmem:[%s3768_s8 + $0x1b4] sm:$0xf0]  ;;  %v2345_v5 = vor.u32 %v2877_v0, %v2344_v63  ;;  %v2843_v7 = vld [vmem:[%s3768_s8 + $0x24] sm:$0xf0] }
  0x96   : > { %1022 = vmatpush.bf16.msra.mxu3 %v2425_v49  ;;  %v2272_v8 = vld [vmem:[%s3768_s8 + $0xa0] sm:$0xf]  ;;  %v2409_v9 = vor.u32 %v2893_v2, %v2408_v1  ;;  %v2859_v10 = vld [vmem:[%s3768_s8 + $0xa4] sm:$0xf0]  ;;  %v2209_v15 = vor.u32 %v2843_v7, %v2208_v6  ;;  %v2200_v18 = vld [vmem:[%s3768_s8 + $0x10] sm:$0xf] }
  0x97   : > { %984 = vmatpush.bf16.msra.mxu0 %v2225_v55  ;;  %v2336_v11 = vld [vmem:[%s3768_s8 + $0x120] sm:$0xf]  ;;  %v2875_v12 = vld [vmem:[%s3768_s8 + $0x124] sm:$0xf0]  ;;  %v2273_v16 = vor.u32 %v2859_v10, %v2272_v8  ;;  %v2841_v19 = vld [vmem:[%s3768_s8 + $0x14] sm:$0xf0] }
  0x98   : > { %997 = vmatpush.bf16.msra.mxu1 %v2289_v56  ;;  %v2400_v13 = vld [vmem:[%s3768_s8 + $0x1a0] sm:$0xf]  ;;  %v2891_v14 = vld [vmem:[%s3768_s8 + $0x1a4] sm:$0xf0]  ;;  %v2337_v17 = vor.u32 %v2875_v12, %v2336_v11  ;;  %v2264_v20 = vld [vmem:[%s3768_s8 + $0x90] sm:$0xf]  ;;  %v2201_v28 = vor.u32 %v2841_v19, %v2200_v18 }
  0x99   : > { %1010 = vmatpush.bf16.msra.mxu2 %v2353_v57  ;;  %v2401_v21 = vor.u32 %v2891_v14, %v2400_v13  ;;  %v2857_v22 = vld [vmem:[%s3768_s8 + $0x94] sm:$0xf0]  ;;  %v2328_v23 = vld [vmem:[%s3768_s8 + $0x110] sm:$0xf]  ;;  %v2192_v27 = vld [vmem:[%s3768_s8] sm:$0xf] }
  0x9a   : > { %1023 = vmatpush.bf16.msra.mxu3 %v2417_v61  ;;  %v2873_v24 = vld [vmem:[%s3768_s8 + $0x114] sm:$0xf0]  ;;  %v2392_v25 = vld [vmem:[%s3768_s8 + $0x190] sm:$0xf]  ;;  %v2839_v29 = vld [vmem:[%s3768_s8 + $0x4] sm:$0xf0]  ;;  %v2265_v32 = vor.u32 %v2857_v22, %v2264_v20 }
  0x9b   : > { %985 = vmatpush.bf16.msra.mxu0 %v2217_v3  ;;  %v2889_v26 = vld [vmem:[%s3768_s8 + $0x194] sm:$0xf0]  ;;  %v2256_v30 = vld [vmem:[%s3768_s8 + $0x80] sm:$0xf]  ;;  %v2855_v31 = vld [vmem:[%s3768_s8 + $0x84] sm:$0xf0]  ;;  %v2329_v33 = vor.u32 %v2873_v24, %v2328_v23  ;;  %v2193_v43 = vor.u32 %v2839_v29, %v2192_v27 }
  0x9c   : > { %998 = vmatpush.bf16.msra.mxu1 %v2281_v4  ;;  %v2320_v34 = vld [vmem:[%s3768_s8 + $0x100] sm:$0xf]  ;;  %v2871_v35 = vld [vmem:[%s3768_s8 + $0x104] sm:$0xf0]  ;;  %v576_v36 = vld [vmem:[%s3760_s1] sm:$0xff]  ;;  %v2393_v37 = vor.u32 %v2889_v26, %v2392_v25  ;;  %v2257_v47 = vor.u32 %v2855_v31, %v2256_v30  ;;  %vm1585_vm3 = vcmask 1041408  }
  0x9d   : > { %1011 = vmatpush.bf16.msra.mxu2 %v2345_v5  ;;  %v2384_v38 = vld [vmem:[%s3768_s8 + $0x180] sm:$0xf]  ;;  %v2887_v39 = vld [vmem:[%s3768_s8 + $0x184] sm:$0xf0]  ;;  %578 = vst [vmem:[#allocation1] ss:$4 sm:$0xff] %v576_v36  ;;  %v2321_v48 = vor.u32 %v2871_v35, %v2320_v34 }
  0x9e   : > { %1024 = vmatpush.bf16.msra.mxu3 %v2409_v9  ;;  %v2852_v40 = vld [vmem:[%s3768_s8 + $0x74] sm:$0xf]  ;;  %v2250_v41 = vld [vmem:[%s3768_s8 + $0x78] sm:$0xf0]  ;;  %v2385_v51 = vor.u32 %v2887_v39, %v2384_v38  ;;  %v2850_v53 = vld [vmem:[%s3768_s8 + $0x64] sm:$0xf] }
  0x9f   : > { %986 = vmatpush.bf16.msra.mxu0 %v2209_v15  ;;  %v2868_v42 = vld [vmem:[%s3768_s8 + $0xf4] sm:$0xf]  ;;  %v2314_v44 = vld [vmem:[%s3768_s8 + $0xf8] sm:$0xf0]  ;;  %v2253_v52 = vor.u32 %v2852_v40, %v2250_v41  ;;  %v2242_v54 = vld [vmem:[%s3768_s8 + $0x68] sm:$0xf0] }
  0xa0   : > { %999 = vmatpush.bf16.msra.mxu1 %v2273_v16  ;;  %v2884_v45 = vld [vmem:[%s3768_s8 + $0x174] sm:$0xf]  ;;  %v2378_v46 = vld [vmem:[%s3768_s8 + $0x178] sm:$0xf0]  ;;  %v2317_v55 = vor.u32 %v2868_v42, %v2314_v44  ;;  %v2866_v57 = vld [vmem:[%s3768_s8 + $0xe4] sm:$0xf]  ;;  %v2245_v2 = vor.u32 %v2850_v53, %v2242_v54 }
  0xa1   : > { %1012 = vmatpush.bf16.msra.mxu2 %v2337_v17  ;;  %v2900_v49 = vld [vmem:[%s3768_s8 + $0x1f4] sm:$0xf]  ;;  %v2442_v50 = vld [vmem:[%s3768_s8 + $0x1f8] sm:$0xf0]  ;;  %v2381_v56 = vor.u32 %v2884_v45, %v2378_v46  ;;  %v2306_v58 = vld [vmem:[%s3768_s8 + $0xe8] sm:$0xf0] }
  0xa2   : > { %1025 = vmatpush.bf16.msra.mxu3 %v2401_v21  ;;  %v2882_v59 = vld [vmem:[%s3768_s8 + $0x164] sm:$0xf]  ;;  %v2445_v60 = vor.u32 %v2900_v49, %v2442_v50  ;;  %v2370_v61 = vld [vmem:[%s3768_s8 + $0x168] sm:$0xf0]  ;;  %v2309_v6 = vor.u32 %v2866_v57, %v2306_v58  ;;  %v2848_v11 = vld [vmem:[%s3768_s8 + $0x54] sm:$0xf] }
  0xa3   : > { %987 = vmatpush.bf16.msra.mxu0 %v2201_v28  ;;  %v2898_v62 = vld [vmem:[%s3768_s8 + $0x1e4] sm:$0xf]  ;;  %v2434_v63 = vld [vmem:[%s3768_s8 + $0x1e8] sm:$0xf0]  ;;  %v2373_v9 = vor.u32 %v2882_v59, %v2370_v61  ;;  %v2234_v12 = vld [vmem:[%s3768_s8 + $0x58] sm:$0xf0] }
  0xa4   : > { %1000 = vmatpush.bf16.msra.mxu1 %v2265_v32  ;;  %v581_v0 = vld.sshfl [vmem:[#allocation1 + $0x10] sm:$0xff pattern:$0x73625140]  ;;  %v579_v1 = vld.sshfl [vmem:[#allocation1] sm:$0xff pattern:$0x73625140]  ;;  %v2437_v14 = vor.u32 %v2898_v62, %v2434_v63  ;;  %v2237_v20 = vor.u32 %v2848_v11, %v2234_v12 }
  0xa5   : > { %1013 = vmatpush.bf16.msra.mxu2 %v2329_v33  ;;  %v3881_v3 = vpack.c.bf16 %v581_v0, %v581_v0  ;;  %v3883_v4 = vpack.c.bf16 %v579_v1, %v579_v1  ;;  %v582_v5 = vld.sshfl [vmem:[#allocation1 + $0x18] sm:$0xff pattern:$0x73625140]  ;;  %v580_v7 = vld.sshfl [vmem:[#allocation1 + $0x8] sm:$0xff pattern:$0x73625140] }
  0xa6   : > { %1026 = vmatpush.bf16.msra.mxu3 %v2393_v37  ;;  %v3885_v8 = vpack.c.bf16 %v582_v5, %v582_v5  ;;  %v3887_v10 = vpack.c.bf16 %v580_v7, %v580_v7  ;;  %v2864_v13 = vld [vmem:[%s3768_s8 + $0xd4] sm:$0xf]  ;;  %v2298_v15 = vld [vmem:[%s3768_s8 + $0xd8] sm:$0xf0]  ;;  %v2846_v23 = vld [vmem:[%s3768_s8 + $0x44] sm:$0xf] }
  0xa7   : > { %988 = vmatpush.bf16.msra.mxu0 %v2193_v43  ;;  %v2880_v16 = vld [vmem:[%s3768_s8 + $0x154] sm:$0xf]  ;;  %v2362_v17 = vld [vmem:[%s3768_s8 + $0x158] sm:$0xf0]  ;;  %v2301_v21 = vor.u32 %v2864_v13, %v2298_v15  ;;  %v2226_v24 = vld [vmem:[%s3768_s8 + $0x48] sm:$0xf0] }
  0xa8   : > { %1001 = vmatpush.bf16.msra.mxu1 %v2257_v47  ;;  %v2896_v18 = vld [vmem:[%s3768_s8 + $0x1d4] sm:$0xf]  ;;  %v2426_v19 = vld [vmem:[%s3768_s8 + $0x1d8] sm:$0xf0]  ;;  %v2365_v22 = vor.u32 %v2880_v16, %v2362_v17  ;;  %v2862_v25 = vld [vmem:[%s3768_s8 + $0xc4] sm:$0xf]  ;;  %v2229_v32 = vor.u32 %v2846_v23, %v2226_v24 }
  0xa9   : > { %1014 = vmatpush.bf16.msra.mxu2 %v2321_v48  ;;  %v2429_v26 = vor.u32 %v2896_v18, %v2426_v19  ;;  %v2290_v27 = vld [vmem:[%s3768_s8 + $0xc8] sm:$0xf0]  ;;  %v2878_v28 = vld [vmem:[%s3768_s8 + $0x144] sm:$0xf]  ;;  %v2844_v35 = vld [vmem:[%s3768_s8 + $0x34] sm:$0xf] }
  0xaa   : > { %1027 = vmatpush.bf16.msra.mxu3 %v2385_v51  ;;  %989 = vmatmul.bf16.vlgmr.msra.gmra.mxu0 %v3883_v4  ;;  %v2354_v29 = vld [vmem:[%s3768_s8 + $0x148] sm:$0xf0]  ;;  %v2894_v30 = vld [vmem:[%s3768_s8 + $0x1c4] sm:$0xf]  ;;  %v2293_v33 = vor.u32 %v2862_v25, %v2290_v27  ;;  %v2218_v36 = vld [vmem:[%s3768_s8 + $0x38] sm:$0xf0] }
  0xab   : > { %1033 = vmatpush.bf16.msrb.mxu0 %v2253_v52  ;;  %1002 = vmatmul.bf16.vlgmr.msra.gmra.mxu1 %v3887_v10  ;;  %v2418_v31 = vld [vmem:[%s3768_s8 + $0x1c8] sm:$0xf0]  ;;  %v2357_v34 = vor.u32 %v2878_v28, %v2354_v29  ;;  %v2860_v37 = vld [vmem:[%s3768_s8 + $0xb4] sm:$0xf]  ;;  %v2282_v39 = vld [vmem:[%s3768_s8 + $0xb8] sm:$0xf0]  ;;  %v2221_v44 = vor.u32 %v2844_v35, %v2218_v36 }
  0xac   : > { %1046 = vmatpush.bf16.msrb.mxu1 %v2317_v55  ;;  %1015 = vmatmul.bf16.vlgmr.msra.gmra.mxu2 %v3881_v3  ;;  %v2421_v38 = vor.u32 %v2894_v30, %v2418_v31  ;;  %v2876_v40 = vld [vmem:[%s3768_s8 + $0x134] sm:$0xf]  ;;  %v2346_v41 = vld [vmem:[%s3768_s8 + $0x138] sm:$0xf0]  ;;  %v2285_v45 = vor.u32 %v2860_v37, %v2282_v39  ;;  %v2842_v47 = vld [vmem:[%s3768_s8 + $0x24] sm:$0xf] }
  0xad   : > { %1059 = vmatpush.bf16.msrb.mxu2 %v2381_v56  ;;  %1028 = vmatmul.bf16.vlgmr.msra.gmra.mxu3 %v3885_v8  ;;  %v2892_v42 = vld [vmem:[%s3768_s8 + $0x1b4] sm:$0xf]  ;;  %v2410_v43 = vld [vmem:[%s3768_s8 + $0x1b8] sm:$0xf0]  ;;  %v2349_v46 = vor.u32 %v2876_v40, %v2346_v41  ;;  %v2210_v48 = vld [vmem:[%s3768_s8 + $0x28] sm:$0xf0] }
  0xae   : > { %1072 = vmatpush.bf16.msrb.mxu3 %v2445_v60  ;;  %v2858_v49 = vld [vmem:[%s3768_s8 + $0xa4] sm:$0xf]  ;;  %v2413_v50 = vor.u32 %v2892_v42, %v2410_v43  ;;  %v2274_v51 = vld [vmem:[%s3768_s8 + $0xa8] sm:$0xf0]  ;;  %v2213_v56 = vor.u32 %v2842_v47, %v2210_v48  ;;  %v2840_v59 = vld [vmem:[%s3768_s8 + $0x14] sm:$0xf] }
  0xaf   : > { %1034 = vmatpush.bf16.msrb.mxu0 %v2245_v2  ;;  %v2874_v52 = vld [vmem:[%s3768_s8 + $0x124] sm:$0xf]  ;;  %v2338_v53 = vld [vmem:[%s3768_s8 + $0x128] sm:$0xf0]  ;;  %v2277_v57 = vor.u32 %v2858_v49, %v2274_v51  ;;  %v2202_v60 = vld [vmem:[%s3768_s8 + $0x18] sm:$0xf0] }
  0xb0   : > { %1047 = vmatpush.bf16.msrb.mxu1 %v2309_v6  ;;  %v2890_v54 = vld [vmem:[%s3768_s8 + $0x1a4] sm:$0xf]  ;;  %v2402_v55 = vld [vmem:[%s3768_s8 + $0x1a8] sm:$0xf0]  ;;  %v2341_v58 = vor.u32 %v2874_v52, %v2338_v53  ;;  %v2856_v61 = vld [vmem:[%s3768_s8 + $0x94] sm:$0xf]  ;;  %v2205_v6 = vor.u32 %v2840_v59, %v2202_v60 }
  0xb1   : > { %1060 = vmatpush.bf16.msrb.mxu2 %v2373_v9  ;;  %v2405_v62 = vor.u32 %v2890_v54, %v2402_v55  ;;  %v2266_v63 = vld [vmem:[%s3768_s8 + $0x98] sm:$0xf0]  ;;  %v2872_v0 = vld [vmem:[%s3768_s8 + $0x114] sm:$0xf]  ;;  %v2838_v7 = vld [vmem:[%s3768_s8 + $0x4] sm:$0xf] }
  0xb2   : > { %1073 = vmatpush.bf16.msrb.mxu3 %v2437_v14  ;;  %v2330_v1 = vld [vmem:[%s3768_s8 + $0x118] sm:$0xf0]  ;;  %v2888_v2 = vld [vmem:[%s3768_s8 + $0x194] sm:$0xf]  ;;  %v2269_v9 = vor.u32 %v2856_v61, %v2266_v63  ;;  %v2194_v12 = vld [vmem:[%s3768_s8 + $0x8] sm:$0xf0] }
  0xb3   : > { %1035 = vmatpush.bf16.msrb.mxu0 %v2237_v20  ;;  %v2394_v5 = vld [vmem:[%s3768_s8 + $0x198] sm:$0xf0]  ;;  %v2333_v11 = vor.u32 %v2872_v0, %v2330_v1  ;;  %v2854_v13 = vld [vmem:[%s3768_s8 + $0x84] sm:$0xf]  ;;  %v2258_v14 = vld [vmem:[%s3768_s8 + $0x88] sm:$0xf0] }
  0xb4   : > { %1048 = vmatpush.bf16.msrb.mxu1 %v2301_v21  ;;  %v2397_v15 = vor.u32 %v2888_v2, %v2394_v5  ;;  %v2870_v16 = vld [vmem:[%s3768_s8 + $0x104] sm:$0xf]  ;;  %v2322_v17 = vld [vmem:[%s3768_s8 + $0x108] sm:$0xf0]  ;;  %v2932_v21 = vld [vmem:[%s3777_s27 + $0xec] sm:$0xf0]  ;;  %v2261_v25 = vor.u32 %v2854_v13, %v2258_v14 }
  0xb5   : > { %1061 = vmatpush.bf16.msrb.mxu2 %v2365_v22  ;;  %v2886_v18 = vld [vmem:[%s3768_s8 + $0x184] sm:$0xf]  ;;  %v2386_v19 = vld [vmem:[%s3768_s8 + $0x188] sm:$0xf0]  ;;  %v2197_v22 = vor.u32 %v2838_v7, %v2194_v12  ;;  %v2930_v23 = vld [vmem:[%s3777_s27 + $0xe4] sm:$0xf] }
  0xb6   : > { %1074 = vmatpush.bf16.msrb.mxu3 %v2429_v26  ;;  %v2560_v20 = vld [vmem:[%s3777_s27 + $0xe0] sm:$0xf]  ;;  %v2562_v24 = vld [vmem:[%s3777_s27 + $0xf0] sm:$0xf0]  ;;  %v2325_v26 = vor.u32 %v2870_v16, %v2322_v17  ;;  %v2389_v27 = vor.u32 %v2886_v18, %v2386_v19  ;;  %v2928_v30 = vld [vmem:[%s3777_s27 + $0xcc] sm:$0xf0] }
  0xb7   : > { %1036 = vmatpush.bf16.msrb.mxu0 %v2229_v32  ;;  %v2561_v28 = vor.u32 %v2932_v21, %v2560_v20  ;;  %v2544_v29 = vld [vmem:[%s3777_s27 + $0xc0] sm:$0xf]  ;;  %v2565_v31 = vor.u32 %v2930_v23, %v2562_v24  ;;  %v2926_v35 = vld [vmem:[%s3777_s27 + $0xc4] sm:$0xf]  ;;  %v2546_v36 = vld [vmem:[%s3777_s27 + $0xd0] sm:$0xf0] }
  0xb8   : > { %1049 = vmatpush.bf16.msrb.mxu1 %v2293_v33  ;;  %v2688_v32 = vld [vmem:[%s3777_s27 + $0x1e0] sm:$0xf]  ;;  %v2964_v33 = vld [vmem:[%s3777_s27 + $0x1ec] sm:$0xf0]  ;;  %v2690_v37 = vld [vmem:[%s3777_s27 + $0x1f0] sm:$0xf0]  ;;  %v2545_v39 = vor.u32 %v2928_v30, %v2544_v29  ;;  %v2549_v41 = vor.u32 %v2926_v35, %v2546_v36 }
  0xb9   : > { %1062 = vmatpush.bf16.msrb.mxu2 %v2357_v34  ;;  %v2962_v34 = vld [vmem:[%s3777_s27 + $0x1e4] sm:$0xf]  ;;  %v2528_v42 = vld [vmem:[%s3777_s27 + $0xa0] sm:$0xf]  ;;  %v2924_v43 = vld [vmem:[%s3777_s27 + $0xac] sm:$0xf0] }
  0xba   : > { %1075 = vmatpush.bf16.msrb.mxu3 %v2421_v38  ;;  %v2689_v38 = vor.u32 %v2964_v33, %v2688_v32  ;;  %v2693_v40 = vor.u32 %v2962_v34, %v2690_v37  ;;  %v2512_v47 = vld [vmem:[%s3777_s27 + $0x80] sm:$0xf]  ;;  %v2920_v48 = vld [vmem:[%s3777_s27 + $0x8c] sm:$0xf0]  ;;  %v2914_v52 = vld [vmem:[%s3777_s27 + $0x64] sm:$0xf] }
  0xbb   : > { %1037 = vmatpush.bf16.msrb.mxu0 %v2221_v44  ;;  %v2922_v44 = vld [vmem:[%s3777_s27 + $0xa4] sm:$0xf]  ;;  %v2513_v49 = vor.u32 %v2920_v48, %v2512_v47  ;;  %v2916_v51 = vld [vmem:[%s3777_s27 + $0x6c] sm:$0xf0]  ;;  %v2498_v53 = vld [vmem:[%s3777_s27 + $0x70] sm:$0xf0] }
  0xbc   : > { %1050 = vmatpush.bf16.msrb.mxu1 %v2285_v45  ;;  %v2530_v45 = vld [vmem:[%s3777_s27 + $0xb0] sm:$0xf0]  ;;  %v2501_v55 = vor.u32 %v2914_v52, %v2498_v53  ;;  %v2908_v63 = vld [vmem:[%s3777_s27 + $0x2c] sm:$0xf0]  ;;  %v2906_v0 = vld [vmem:[%s3777_s27 + $0x24] sm:$0xf] }
  0xbd   : > { %1063 = vmatpush.bf16.msrb.mxu2 %v2349_v46  ;;  %v2533_v46 = vor.u32 %v2922_v44, %v2530_v45  ;;  %v2482_v59 = vld [vmem:[%s3777_s27 + $0x50] sm:$0xf0]  ;;  %v2904_v7 = vld [vmem:[%s3777_s27 + $0xc] sm:$0xf0]  ;;  %v2568_v12 = vld [vmem:[%s3777_s27 + $0xe8] sm:$0xf] }
  0xbe   : > { %1076 = vmatpush.bf16.msrb.mxu3 %v2413_v50  ;;  %v2496_v50 = vld [vmem:[%s3777_s27 + $0x60] sm:$0xf]  ;;  %v2466_v1 = vld [vmem:[%s3777_s27 + $0x30] sm:$0xf0]  ;;  %v2933_v13 = vld [vmem:[%s3777_s27 + $0xf4] sm:$0xf0] }
  0xbf   : > { %1038 = vmatpush.bf16.msrb.mxu0 %v2213_v56  ;;  %v2497_v54 = vor.u32 %v2916_v51, %v2496_v50  ;;  %v2480_v56 = vld [vmem:[%s3777_s27 + $0x40] sm:$0xf]  ;;  %v2469_v5 = vor.u32 %v2906_v0, %v2466_v1  ;;  %v2931_v14 = vld [vmem:[%s3777_s27 + $0xec] sm:$0xf]  ;;  %v2569_v18 = vor.u32 %v2933_v13, %v2568_v12  ;;  %v2960_v21 = vld [vmem:[%s3777_s27 + $0x1cc] sm:$0xf0] }
  0xc0   : > { %1051 = vmatpush.bf16.msrb.mxu1 %v2277_v57  ;;  %v2912_v57 = vld [vmem:[%s3777_s27 + $0x4c] sm:$0xf0]  ;;  %v2672_v20 = vld [vmem:[%s3777_s27 + $0x1c0] sm:$0xf]  ;;  %v2674_v24 = vld [vmem:[%s3777_s27 + $0x1d0] sm:$0xf0] }
  0xc1   : > { %1064 = vmatpush.bf16.msrb.mxu2 %v2341_v58  ;;  %v2910_v58 = vld [vmem:[%s3777_s27 + $0x44] sm:$0xf]  ;;  %v2481_v60 = vor.u32 %v2912_v57, %v2480_v56  ;;  %v2673_v23 = vor.u32 %v2960_v21, %v2672_v20  ;;  %v2927_v29 = vld [vmem:[%s3777_s27 + $0xcc] sm:$0xf]  ;;  %v2554_v30 = vld [vmem:[%s3777_s27 + $0xd8] sm:$0xf0] }
  0xc2   : > { %1077 = vmatpush.bf16.msrb.mxu3 %v2405_v62  ;;  %v2485_v61 = vor.u32 %v2910_v58, %v2482_v59  ;;  %v2464_v62 = vld [vmem:[%s3777_s27 + $0x20] sm:$0xf]  ;;  %v2956_v33 = vld [vmem:[%s3777_s27 + $0x1ac] sm:$0xf0]  ;;  %v2954_v34 = vld [vmem:[%s3777_s27 + $0x1a4] sm:$0xf] }
  0xc3   : > { %1039 = vmatpush.bf16.msrb.mxu0 %v2205_v6  ;;  %v2465_v2 = vor.u32 %v2908_v63, %v2464_v62  ;;  %v2448_v6 = vld [vmem:[%s3777_s27] sm:$0xf]  ;;  %v2658_v36 = vld [vmem:[%s3777_s27 + $0x1b0] sm:$0xf0]  ;;  %v2536_v37 = vld [vmem:[%s3777_s27 + $0xa8] sm:$0xf] }
  0xc4   : > { %1052 = vmatpush.bf16.msrb.mxu1 %v2269_v9  ;;  %v2902_v9 = vld [vmem:[%s3777_s27 + $0x4] sm:$0xf]  ;;  %v2449_v16 = vor.u32 %v2904_v7, %v2448_v6  ;;  %v2656_v32 = vld [vmem:[%s3777_s27 + $0x1a0] sm:$0xf]  ;;  %v2952_v45 = vld [vmem:[%s3777_s27 + $0x18c] sm:$0xf0] }
  0xc5   : > { %1065 = vmatpush.bf16.msrb.mxu2 %v2333_v11  ;;  %v2450_v11 = vld [vmem:[%s3777_s27 + $0x10] sm:$0xf0]  ;;  %v2657_v35 = vor.u32 %v2956_v33, %v2656_v32  ;;  %v2640_v44 = vld [vmem:[%s3777_s27 + $0x180] sm:$0xf]  ;;  %v2520_v48 = vld [vmem:[%s3777_s27 + $0x88] sm:$0xf] }
  0xc6   : > { %1078 = vmatpush.bf16.msrb.mxu3 %v2397_v15  ;;  %v2570_v15 = vld [vmem:[%s3777_s27 + $0xf8] sm:$0xf0]  ;;  %v2453_v17 = vor.u32 %v2902_v9, %v2450_v11  ;;  %v2642_v47 = vld [vmem:[%s3777_s27 + $0x190] sm:$0xf0]  ;;  %v2624_v52 = vld [vmem:[%s3777_s27 + $0x160] sm:$0xf] }
  0xc7   : > { %1040 = vmatpush.bf16.msrb.mxu0 %v2197_v22  ;;  %v2573_v19 = vor.u32 %v2931_v14, %v2570_v15  ;;  %v2958_v22 = vld [vmem:[%s3777_s27 + $0x1c4] sm:$0xf]  ;;  %v2522_v50 = vld [vmem:[%s3777_s27 + $0x98] sm:$0xf0]  ;;  %v2948_v53 = vld [vmem:[%s3777_s27 + $0x16c] sm:$0xf0] }
  0xc8   : > { %1053 = vmatpush.bf16.msrb.mxu1 %v2261_v25  ;;  %v2552_v25 = vld [vmem:[%s3777_s27 + $0xc8] sm:$0xf]  ;;  %v2626_v56 = vld [vmem:[%s3777_s27 + $0x170] sm:$0xf0]  ;;  %v2917_v58 = vld [vmem:[%s3777_s27 + $0x74] sm:$0xf0] }
  0xc9   : > { %1066 = vmatpush.bf16.msrb.mxu2 %v2325_v26  ;;  %v2929_v26 = vld [vmem:[%s3777_s27 + $0xd4] sm:$0xf0]  ;;  %v2504_v57 = vld [vmem:[%s3777_s27 + $0x68] sm:$0xf]  ;;  %v2506_v62 = vld [vmem:[%s3777_s27 + $0x78] sm:$0xf0] }
  0xca   : > { %1079 = vmatpush.bf16.msrb.mxu3 %v2389_v27  ;;  %1041 = vmatmul.bf16.vlgmr.msrb.gmra.mxu0 %v3883_v4  ;;  %v2529_v4 = vor.u32 %v2924_v43, %v2528_v42  ;;  %v2677_v27 = vor.u32 %v2958_v22, %v2674_v24  ;;  %v2538_v42 = vld [vmem:[%s3777_s27 + $0xb8] sm:$0xf0]  ;;  %v2608_v63 = vld [vmem:[%s3777_s27 + $0x140] sm:$0xf]  ;;  %v2944_v1 = vld [vmem:[%s3777_s27 + $0x14c] sm:$0xf0] }
  0xcb   : > { %1474 = vmatpush.bf16.msra.mxu0 %v2561_v28  ;;  %1054 = vmatmul.bf16.vlgmr.msrb.gmra.mxu1 %v3887_v10  ;;  %v2918_v10 = vld [vmem:[%s3777_s27 + $0x84] sm:$0xf]  ;;  %v2553_v28 = vor.u32 %v2929_v26, %v2552_v25  ;;  %v2609_v6 = vor.u32 %v2944_v1, %v2608_v63  ;;  %v2488_v9 = vld [vmem:[%s3777_s27 + $0x48] sm:$0xf]  ;;  %v2913_v11 = vld [vmem:[%s3777_s27 + $0x54] sm:$0xf0] }
  0xcc   : > { %1067 = vmatmul.bf16.vlgmr.msrb.gmra.mxu2 %v3881_v3  ;;  %1487 = vmatpush.bf16.msra.mxu1 %v2689_v38  ;;  %v2514_v3 = vld [vmem:[%s3777_s27 + $0x90] sm:$0xf0]  ;;  %v2925_v38 = vld [vmem:[%s3777_s27 + $0xb4] sm:$0xf0]  ;;  %v2911_v12 = vld [vmem:[%s3777_s27 + $0x4c] sm:$0xf]  ;;  %v2489_v13 = vor.u32 %v2913_v11, %v2488_v9 }
  0xcd   : > { %1500 = vmatpush.bf16.msra.mxu2 %v2565_v31  ;;  %1080 = vmatmul.bf16.vlgmr.msrb.gmra.mxu3 %v3885_v8  ;;  %v2517_v8 = vor.u32 %v2918_v10, %v2514_v3  ;;  %v2557_v31 = vor.u32 %v2927_v29, %v2554_v30  ;;  %v2921_v10 = vld [vmem:[%s3777_s27 + $0x94] sm:$0xf0]  ;;  %v2490_v14 = vld [vmem:[%s3777_s27 + $0x58] sm:$0xf0]  ;;  %v2592_v15 = vld [vmem:[%s3777_s27 + $0x120] sm:$0xf] }
  0xce   : > { %1513 = vmatpush.bf16.msra.mxu3 %v2693_v40  ;;  %v2537_v40 = vor.u32 %v2925_v38, %v2536_v37  ;;  %v2472_v20 = vld [vmem:[%s3777_s27 + $0x28] sm:$0xf]  ;;  %v2909_v22 = vld [vmem:[%s3777_s27 + $0x34] sm:$0xf0]  ;;  %v2474_v24 = vld [vmem:[%s3777_s27 + $0x38] sm:$0xf0] }
  0xcf   : > { %1475 = vmatpush.bf16.msra.mxu0 %v2545_v39  ;;  %v2661_v39 = vor.u32 %v2954_v34, %v2658_v36  ;;  %v2473_v26 = vor.u32 %v2909_v22, %v2472_v20  ;;  %v2934_v29 = vld [vmem:[%s3777_s27 + $0x104] sm:$0xf]  ;;  %v2456_v32 = vld [vmem:[%s3777_s27 + $0x8] sm:$0xf]  ;;  %v2905_v33 = vld [vmem:[%s3777_s27 + $0x14] sm:$0xf0] }
  0xd0   : > { %1488 = vmatpush.bf16.msra.mxu1 %v2673_v23  ;;  %v2907_v23 = vld [vmem:[%s3777_s27 + $0x2c] sm:$0xf]  ;;  %v4043_v37 = vld [vmem:[%s452_s25] sm:$0x3]  ;;  %v2648_v63 = vld [vmem:[%s3777_s27 + $0x188] sm:$0xf] }
  0xd1   : > { %1501 = vmatpush.bf16.msra.mxu2 %v2549_v41  ;;  %v2923_v41 = vld [vmem:[%s3777_s27 + $0xac] sm:$0xf]  ;;  %v2477_v30 = vor.u32 %v2907_v23, %v2474_v24  ;;  %v2945_v20 = vld [vmem:[%s3777_s27 + $0x154] sm:$0xf0]  ;;  %v2618_v24 = vld [vmem:[%s3777_s27 + $0x158] sm:$0xf0] }
  0xd2   : > { %1514 = vmatpush.bf16.msra.mxu3 %v2677_v27  ;;  %v2541_v43 = vor.u32 %v2923_v41, %v2538_v42  ;;  %v2576_v27 = vld [vmem:[%s3777_s27 + $0x100] sm:$0xf]  ;;  %v2903_v34 = vld [vmem:[%s3777_s27 + $0xc] sm:$0xf]  ;;  %v2696_v41 = vld [vmem:[%s3777_s27 + $0x1e8] sm:$0xf] }
  0xd3   : > { %1476 = vmatpush.bf16.msra.mxu0 %v2529_v4  ;;  %v2950_v4 = vld [vmem:[%s3777_s27 + $0x184] sm:$0xf]  ;;  %v2965_v42 = vld [vmem:[%s3777_s27 + $0x1f4] sm:$0xf0]  ;;  %v2951_v1 = vld [vmem:[%s3777_s27 + $0x18c] sm:$0xf] }
  0xd4   : > { %1489 = vmatpush.bf16.msra.mxu1 %v2657_v35  ;;  %v2645_v3 = vor.u32 %v2950_v4, %v2642_v47  ;;  %v2458_v35 = vld [vmem:[%s3777_s27 + $0x18] sm:$0xf0]  ;;  %v657_v4 = vperm.slane %v4043_v37, 0  ;;  %v2680_v47 = vld [vmem:[%s3777_s27 + $0x1c8] sm:$0xf]  ;;  %vm1587_vm4 = vcmask 1045508  }
  0xd5   : > { %1502 = vmatpush.bf16.msra.mxu2 %v2533_v46  ;;  %v2641_v46 = vor.u32 %v2952_v45, %v2640_v44  ;;  %v2697_v44 = vor.u32 %v2965_v42, %v2696_v41  ;;  %v2698_v45 = vld [vmem:[%s3777_s27 + $0x1f8] sm:$0xf0]  ;;  %v2943_v23 = vld [vmem:[%s3777_s27 + $0x14c] sm:$0xf]  ;;  %v658_v41 = vperm.slane %v4043_v37, 1  ;;  %vm1589_vm5 = vcmask 1043456  }
  0xd6   : > { %1515 = vmatpush.bf16.msra.mxu3 %v2661_v39  ;;  %v2457_v39 = vor.u32 %v2905_v33, %v2456_v32  ;;  %s4226_s18 = sld [smem:[#allocation25_spill]] }
  0xd7   : > { %1477 = vmatpush.bf16.msra.mxu0 %v2513_v49  ;;  %v2521_v49 = vor.u32 %v2921_v10, %v2520_v48  ;;  %v2961_v48 = vld [vmem:[%s3777_s27 + $0x1d4] sm:$0xf0]  ;;  %v2959_v10 = vld [vmem:[%s3777_s27 + $0x1cc] sm:$0xf] }
  0xd8   : > { %1490 = vmatpush.bf16.msra.mxu1 %v2641_v46 }
  0xd9   : > { %1503 = vmatpush.bf16.msra.mxu2 %v2517_v8  ;;  %v2919_v8 = vld [vmem:[%s3777_s27 + $0x8c] sm:$0xf] }
  0xda   : > { %v2525_v51 = vor.u32 %v2919_v8, %v2522_v50  ;;  %1516 = vmatpush.bf16.msra.mxu3 %v2645_v3  ;;  %v2682_v8 = vld [vmem:[%s3777_s27 + $0x1d8] sm:$0xf0] }
  0xdb   : > { %1478 = vmatpush.bf16.msra.mxu0 %v2497_v54  ;;  %v2946_v54 = vld [vmem:[%s3777_s27 + $0x164] sm:$0xf] }
  0xdc   : > { %v2629_v59 = vor.u32 %v2946_v54, %v2626_v56  ;;  %v2664_v54 = vld [vmem:[%s3777_s27 + $0x1a8] sm:$0xf]  ;;  %v2955_v56 = vld [vmem:[%s3777_s27 + $0x1ac] sm:$0xf]  ;;  %p2702_p7 = scmp.ne.s32.totalorder %s4226_s18, 3 }
  0xdd   : > { %1504 = vmatpush.bf16.msra.mxu2 %v2501_v55  ;;  %v2625_v55 = vor.u32 %v2948_v53, %v2624_v52  ;;  %v2685_v52 = vor.u32 %v2959_v10, %v2682_v8 }
  0xde   : > { %1517 = vmatpush.bf16.msra.mxu3 %v2629_v59 }
  0xdf   : > { %1479 = vmatpush.bf16.msra.mxu0 %v2481_v60  ;;  %v2505_v60 = vor.u32 %v2917_v58, %v2504_v57  ;;  %1491 = vmatpush.bf16.msra.mxu1 %v2625_v55  ;;  %v2957_v55 = vld [vmem:[%s3777_s27 + $0x1b4] sm:$0xf0]  ;;  %v2666_v58 = vld [vmem:[%s3777_s27 + $0x1b8] sm:$0xf0] }
  0xe0   : > { %v2665_v57 = vor.u32 %v2957_v55, %v2664_v54 }
  0xe1   : > { %1505 = vmatpush.bf16.msra.mxu2 %v2485_v61  ;;  %v2915_v61 = vld [vmem:[%s3777_s27 + $0x6c] sm:$0xf] }
  0xe2   : > { %v2509_v0 = vor.u32 %v2915_v61, %v2506_v62 }
  0xe3   : > { %1480 = vmatpush.bf16.msra.mxu0 %v2465_v2  ;;  %v2942_v2 = vld [vmem:[%s3777_s27 + $0x144] sm:$0xf]  ;;  %1492 = vmatpush.bf16.msra.mxu1 %v2609_v6 }
  0xe5   : > { %1506 = vmatpush.bf16.msra.mxu2 %v2469_v5  ;;  %v2610_v5 = vld [vmem:[%s3777_s27 + $0x150] sm:$0xf0] }
  0xe6   : > { %v2613_v7 = vor.u32 %v2942_v2, %v2610_v5 }
  0xe7   : > { %1481 = vmatpush.bf16.msra.mxu0 %v2449_v16  ;;  %v2940_v16 = vld [vmem:[%s3777_s27 + $0x12c] sm:$0xf0] }
  0xe8   : > { %v2593_v21 = vor.u32 %v2940_v16, %v2592_v15  ;;  %1518 = vmatpush.bf16.msra.mxu3 %v2613_v7  ;;  %v2650_v7 = vld [vmem:[%s3777_s27 + $0x198] sm:$0xf0]  ;;  %v2947_v15 = vld [vmem:[%s3777_s27 + $0x16c] sm:$0xf] }
  0xe9   : > { %1507 = vmatpush.bf16.msra.mxu2 %v2453_v17  ;;  %v2493_v17 = vor.u32 %v2911_v12, %v2490_v14  ;;  %v2653_v11 = vor.u32 %v2951_v1, %v2650_v7  ;;  %v2949_v14 = vld [vmem:[%s3777_s27 + $0x174] sm:$0xf0] }
  0xea   : > { %1493 = vmatpush.bf16.msra.mxu1 %v2593_v21 }
  0xeb   : > { %1526 = vmatpush.bf16.msrb.mxu0 %v2569_v18  ;;  %v2938_v18 = vld [vmem:[%s3777_s27 + $0x124] sm:$0xf] }
  0xed   : > { %1552 = vmatpush.bf16.msrb.mxu2 %v2573_v19  ;;  %v2594_v19 = vld [vmem:[%s3777_s27 + $0x130] sm:$0xf0] }
  0xee   : > { %v2597_v25 = vor.u32 %v2938_v18, %v2594_v19  ;;  %v2634_v18 = vld [vmem:[%s3777_s27 + $0x178] sm:$0xf0]  ;;  %v2616_v19 = vld [vmem:[%s3777_s27 + $0x148] sm:$0xf] }
  0xef   : > { %1527 = vmatpush.bf16.msrb.mxu0 %v2553_v28  ;;  %v2936_v28 = vld [vmem:[%s3777_s27 + $0x10c] sm:$0xf0]  ;;  %v2637_v22 = vor.u32 %v2947_v15, %v2634_v18 }
  0xf0   : > { %v2577_v36 = vor.u32 %v2936_v28, %v2576_v27  ;;  %1519 = vmatpush.bf16.msra.mxu3 %v2597_v25  ;;  %v2621_v27 = vor.u32 %v2943_v23, %v2618_v24  ;;  %v2600_v28 = vld [vmem:[%s3777_s27 + $0x128] sm:$0xf] }
  0xf1   : > { %1553 = vmatpush.bf16.msrb.mxu2 %v2557_v31  ;;  %v2578_v31 = vld [vmem:[%s3777_s27 + $0x110] sm:$0xf0] }
  0xf2   : > { %v2581_v38 = vor.u32 %v2934_v29, %v2578_v31  ;;  %1494 = vmatpush.bf16.msra.mxu1 %v2577_v36  ;;  %v2941_v29 = vld [vmem:[%s3777_s27 + $0x134] sm:$0xf0]  ;;  %v2602_v31 = vld [vmem:[%s3777_s27 + $0x138] sm:$0xf0]  ;;  %v2935_v36 = vld [vmem:[%s3777_s27 + $0x10c] sm:$0xf] }
  0xf3   : > { %1528 = vmatpush.bf16.msrb.mxu0 %v2537_v40  ;;  %v2461_v40 = vor.u32 %v2903_v34, %v2458_v35  ;;  %v2601_v32 = vor.u32 %v2941_v29, %v2600_v28  ;;  %v2584_v34 = vld [vmem:[%s3777_s27 + $0x108] sm:$0xf]  ;;  %v2937_v35 = vld [vmem:[%s3777_s27 + $0x114] sm:$0xf0] }
  0xf4   : > { %1520 = vmatpush.bf16.msra.mxu3 %v2581_v38  ;;  %v2586_v38 = vld [vmem:[%s3777_s27 + $0x118] sm:$0xf0] }
  0xf5   : > { %1554 = vmatpush.bf16.msrb.mxu2 %v2541_v43  ;;  %v2963_v43 = vld [vmem:[%s3777_s27 + $0x1ec] sm:$0xf] }
  0xf6   : > { %v2701_v46 = vor.u32 %v2963_v43, %v2698_v45  ;;  %1539 = vmatpush.bf16.msrb.mxu1 %v2697_v44 }
  0xf7   : > { %1529 = vmatpush.bf16.msrb.mxu0 %v2521_v49  ;;  %v2681_v49 = vor.u32 %v2961_v48, %v2680_v47 }
  0xf8   : > { %1565 = vmatpush.bf16.msrb.mxu3 %v2701_v46 }
  0xf9   : > { %1555 = vmatpush.bf16.msrb.mxu2 %v2525_v51 }
  0xfa   : > { %1540 = vmatpush.bf16.msrb.mxu1 %v2681_v49 }
  0xfb   : > { %1530 = vmatpush.bf16.msrb.mxu0 %v2505_v60  ;;  %v2669_v60 = vor.u32 %v2955_v56, %v2666_v58 }
  0xfc   : > { %1566 = vmatpush.bf16.msrb.mxu3 %v2685_v52 }
  0xfd   : > { %1556 = vmatpush.bf16.msrb.mxu2 %v2509_v0  ;;  %v2953_v0 = vld [vmem:[%s3777_s27 + $0x194] sm:$0xf0] }
  0xfe   : > { %1541 = vmatpush.bf16.msrb.mxu1 %v2665_v57  ;;  %v2649_v6 = vor.u32 %v2953_v0, %v2648_v63 }
  0xff   : > { %1531 = vmatpush.bf16.msrb.mxu0 %v2489_v13  ;;  %v2632_v13 = vld [vmem:[%s3777_s27 + $0x168] sm:$0xf] }
 0x100   : > { %1567 = vmatpush.bf16.msrb.mxu3 %v2669_v60 }
 0x101   : > { %1557 = vmatpush.bf16.msrb.mxu2 %v2493_v17  ;;  %v2633_v17 = vor.u32 %v2949_v14, %v2632_v13  ;;  %v1087_v13 = vld [vmem:[#allocation2] sm:$0xff] }
 0x102   : > { %1542 = vmatpush.bf16.msrb.mxu1 %v2649_v6 }
 0x103   : > { %1532 = vmatpush.bf16.msrb.mxu0 %v2473_v26  ;;  %v2617_v26 = vor.u32 %v2945_v20, %v2616_v19 }
 0x104   : > { %1568 = vmatpush.bf16.msrb.mxu3 %v2653_v11 }
 0x105   : > { %1558 = vmatpush.bf16.msrb.mxu2 %v2477_v30  ;;  %v2939_v30 = vld [vmem:[%s3777_s27 + $0x12c] sm:$0xf] }
 0x106   : > { %1543 = vmatpush.bf16.msrb.mxu1 %v2633_v17  ;;  %v2605_v33 = vor.u32 %v2939_v30, %v2602_v31 }
 0x107   : > { %1533 = vmatpush.bf16.msrb.mxu0 %v2457_v39  ;;  %v2585_v39 = vor.u32 %v2937_v35, %v2584_v34 }
 0x108   : > { %1569 = vmatpush.bf16.msrb.mxu3 %v2637_v22 }
 0x109   : > { %1559 = vmatpush.bf16.msrb.mxu2 %v2461_v40  ;;  %v2589_v40 = vor.u32 %v2935_v36, %v2586_v38 }
 0x10a   : > { %1544 = vmatpush.bf16.msrb.mxu1 %v2617_v26 }
 0x10c   : > { %1570 = vmatpush.bf16.msrb.mxu3 %v2621_v27 }
 0x10e   : > { %1545 = vmatpush.bf16.msrb.mxu1 %v2601_v32 }
 0x110   : > { %1571 = vmatpush.bf16.msrb.mxu3 %v2605_v33 }
 0x112   : > { %1546 = vmatpush.bf16.msrb.mxu1 %v2585_v39 }
 0x114   : > { %1572 = vmatpush.bf16.msrb.mxu3 %v2589_v40 }
 0x127   : > { %v990_v3 = vpop.f32.mrf.mxu0 }
 0x128   : > { %v991_v50 = vadd.f32 %v990_v3, %v657_v4  ;;  %v1003_v51 = vpop.f32.mrf.mxu1 }
 0x12a   : > { %v1004_v53 = vadd.f32 %v1003_v51, %v991_v50 }
 0x12f   : > { %v1016_v59 = vpop.f32.mrf.mxu2  ;;  %v992_v5 = vpop.f32.mrf.mxu0 }
 0x130   : > { %v1017_v61 = vadd.f32 %v1016_v59, %v1004_v53  ;;  %v1029_v62 = vpop.f32.mrf.mxu3  ;;  %v1005_v9 = vpop.f32.mrf.mxu1 }
 0x132   : > { %v1030_v2 = vadd.f32 %v1029_v62, %v1017_v61 }
 0x134   : > { %v1085_v12 = vmax.f32 %v1030_v2, 0.0 }
 0x136   : > { %v1088_v16 = vpack.c.bf16 %v1085_v12, %v1085_v12 }
 0x137   : > { %v1018_v21 = vpop.f32.mrf.mxu2 }
 0x138   : > { %1482 = vmatmul.bf16.vlgmr.msra.gmra.mxu0 %v1088_v16  ;;  %1508 = vmatmul.bf16.vlgmr.msra.gmra.mxu2 %v1088_v16  ;;  %v1031_v25 = vpop.f32.mrf.mxu3 }
 0x147   : > { %v1042_v42 = vpop.f32.mrf.mxu0 }
 0x148   : > { %v1043_v43 = vadd.f32 %v1042_v42, %v658_v41  ;;  %v1055_v44 = vpop.f32.mrf.mxu1  ;;  %1534 = vmatmul.bf16.vlgmr.msrb.gmra.mxu0 %v1088_v16  ;;  %1560 = vmatmul.bf16.vlgmr.msrb.gmra.mxu2 %v1088_v16 }
 0x14a   : > { %v1056_v45 = vadd.f32 %v1055_v44, %v1043_v43 }
 0x14f   : > { %v1068_v4 = vpop.f32.mrf.mxu2  ;;  %v1044_v48 = vpop.f32.mrf.mxu0 }
 0x150   : > { %v1069_v46 = vadd.f32 %v1068_v4, %v1056_v45  ;;  %v1081_v47 = vpop.f32.mrf.mxu3  ;;  %v1057_v10 = vpop.f32.mrf.mxu1 }
 0x152   : > { %v1082_v3 = vadd.f32 %v1081_v47, %v1069_v46 }
 0x154   : > { %v1086_v49 = vmax.f32 %v1082_v3, 0.0 }
 0x156   : > { %v1089_v8 = vpack.c.bf16 %v1086_v49, %v1086_v49 }
 0x157   : > { %v1070_v50 = vpop.f32.mrf.mxu2 }
 0x158   : > { %v1083_v51 = vpop.f32.mrf.mxu3  ;;  %1495 = vmatmul.bf16.vlgmr.msra.gmra.mxu1 %v1089_v8  ;;  %1521 = vmatmul.bf16.vlgmr.msra.gmra.mxu3 %v1089_v8 }
 0x168   : > { %1547 = vmatmul.bf16.vlgmr.msrb.gmra.mxu1 %v1089_v8  ;;  %1573 = vmatmul.bf16.vlgmr.msrb.gmra.mxu3 %v1089_v8 }
 0x1b5   : > { %v1483_v37 = vpop.f32.mrf.mxu0 }
 0x1bb   : > { %v1509_v52 = vpop.f32.mrf.mxu2 }
 0x1bd   : > { %v1485_v53 = vpop.f32.mrf.mxu0 }
 0x1c3   : > { %v1511_v54 = vpop.f32.mrf.mxu2 }
 0x1c5   : > { %v1535_v55 = vpop.f32.mrf.mxu0 }
 0x1cb   : > { %v1561_v56 = vpop.f32.mrf.mxu2 }
 0x1cd   : > { %v1537_v57 = vpop.f32.mrf.mxu0 }
 0x1d3   : > { %v1563_v59 = vpop.f32.mrf.mxu2 }
 0x1d5   : > { %v1496_v58 = vpop.f32.mrf.mxu1 }
 0x1d6   : > { %v1497_v9 = vadd.f32 %v1496_v58, %v1483_v37 }
 0x1db   : > { %v1522_v60 = vpop.f32.mrf.mxu3 }
 0x1dc   : > { %v1523_v0 = vadd.f32 %v1522_v60, %v1509_v52 }
 0x1dd   : > { %v1498_v61 = vpop.f32.mrf.mxu1 }
 0x1de   : > { %v1582_v5 = vrot.slane %v1523_v0, 6 }
 0x1e0   : > { %v1586_v14 = vsel %vm1585_vm3, %v1497_v9, %v1582_v5 }
 0x1e3   : > { %v1524_v62 = vpop.f32.mrf.mxu3 }
 0x1e5   : > { %v1548_v63 = vpop.f32.mrf.mxu1 }
 0x1e6   : > { %v1549_v1 = vadd.f32 %v1548_v63, %v1535_v55 }
 0x1e8   : > { %v1583_v11 = vrot.slane %v1549_v1, 4 }
 0x1eb   : > { %v1574_v2 = vpop.f32.mrf.mxu3 }
 0x1ec   : > { %v1575_v6 = vadd.f32 %v1574_v2, %v1561_v56 }
 0x1ed   : > { %v1550_v7 = vpop.f32.mrf.mxu1 }
 0x1ee   : > { %v1584_v12 = vrot.slane %v1575_v6, 2 }
 0x1f0   : > { %v1588_v15 = vsel %vm1587_vm4, %v1583_v11, %v1584_v12  ;;  %1597 = sbr.rel (%p2702_p7) target bundleno = 676 (0x2a4), region = 84 }
 0x1f1   : > { %v1590_v16 = vsel %vm1589_vm5, %v1586_v14, %v1588_v15 }
 0x1f2   : > { %v1592_v17 = vadd.f32 %v1590_v16, %v1087_v13 }
 0x1f3   : > { %v1576_v18 = vpop.f32.mrf.mxu3 }
 0x1f4   : > { %1593 = vst [vmem:[#allocation2] sm:$0xff] %v1592_v17 }
 0x1f5   : > { %v2973_v19 = vld [vmem:[%s3789_s20 + $0x38] sm:$0xff]  ;;  %v2972_v23 = vld [vmem:[%s3789_s20 + $0x30] sm:$0xff]  ;;  %v2971_v27 = vld [vmem:[%s3789_s20 + $0x28] sm:$0xff] }
 0x1f6   : > { %v2981_v20 = vld [vmem:[%s3789_s20 + $0x78] sm:$0xff]  ;;  %1874 = vmatpush.bf16.msra.mxu0 %v2973_v19  ;;  %v2980_v24 = vld [vmem:[%s3789_s20 + $0x70] sm:$0xff]  ;;  %v2979_v28 = vld [vmem:[%s3789_s20 + $0x68] sm:$0xff] }
 0x1f7   : > { %v2989_v21 = vld [vmem:[%s3789_s20 + $0xb8] sm:$0xff]  ;;  %1887 = vmatpush.bf16.msra.mxu1 %v2981_v20  ;;  %v2988_v25 = vld [vmem:[%s3789_s20 + $0xb0] sm:$0xff]  ;;  %v2987_v29 = vld [vmem:[%s3789_s20 + $0xa8] sm:$0xff] }
 0x1f8   : > { %v2997_v22 = vld [vmem:[%s3789_s20 + $0xf8] sm:$0xff]  ;;  %1900 = vmatpush.bf16.msra.mxu2 %v2989_v21  ;;  %v2996_v26 = vld [vmem:[%s3789_s20 + $0xf0] sm:$0xff]  ;;  %v2995_v30 = vld [vmem:[%s3789_s20 + $0xe8] sm:$0xff] }
 0x1f9   : > { %1913 = vmatpush.bf16.msra.mxu3 %v2997_v22  ;;  %v2970_v31 = vld [vmem:[%s3789_s20 + $0x20] sm:$0xff]  ;;  %v2969_v38 = vld [vmem:[%s3789_s20 + $0x18] sm:$0xff]  ;;  %v2968_v42 = vld [vmem:[%s3789_s20 + $0x10] sm:$0xff] }
 0x1fa   : > { %1875 = vmatpush.bf16.msra.mxu0 %v2972_v23  ;;  %v2978_v32 = vld [vmem:[%s3789_s20 + $0x60] sm:$0xff]  ;;  %v2977_v39 = vld [vmem:[%s3789_s20 + $0x58] sm:$0xff]  ;;  %v2976_v43 = vld [vmem:[%s3789_s20 + $0x50] sm:$0xff] }
 0x1fb   : > { %1888 = vmatpush.bf16.msra.mxu1 %v2980_v24  ;;  %v1598_v33 = vld [vmem:[#allocation2] sm:$0xff]  ;;  %v2984_v44 = vld [vmem:[%s3789_s20 + $0x90] sm:$0xff]  ;;  %v2967_v4 = vld [vmem:[%s3789_s20 + $0x8] sm:$0xff] }
 0x1fc   : > { %1901 = vmatpush.bf16.msra.mxu2 %v2988_v25  ;;  %v2986_v34 = vld [vmem:[%s3789_s20 + $0xa0] sm:$0xff]  ;;  %v1599_v36 = vmax.f32 %v1598_v33, 0.0  ;;  %v2985_v40 = vld [vmem:[%s3789_s20 + $0x98] sm:$0xff]  ;;  %v2992_v45 = vld [vmem:[%s3789_s20 + $0xd0] sm:$0xff] }
 0x1fd   : > { %1914 = vmatpush.bf16.msra.mxu3 %v2996_v26  ;;  %v2994_v35 = vld [vmem:[%s3789_s20 + $0xe0] sm:$0xff]  ;;  %v2993_v41 = vld [vmem:[%s3789_s20 + $0xd8] sm:$0xff]  ;;  %v2975_v46 = vld [vmem:[%s3789_s20 + $0x48] sm:$0xff] }
 0x1fe   : > { %1876 = vmatpush.bf16.msra.mxu0 %v2971_v27  ;;  %1601 = vst [vmem:[#allocation1] ss:$4 sm:$0xff] %v1599_v36  ;;  %v2983_v47 = vld [vmem:[%s3789_s20 + $0x88] sm:$0xff]  ;;  %v2966_v10 = vld [vmem:[%s3789_s20] sm:$0xff]  ;;  %v3137_v57 = vld [vmem:[%s491_s23] ss:$0 sm:$0xff] }
 0x1ff   : > { %1889 = vmatpush.bf16.msra.mxu1 %v2979_v28  ;;  %v2991_v48 = vld [vmem:[%s3789_s20 + $0xc8] sm:$0xff]  ;;  %v2974_v3 = vld [vmem:[%s3789_s20 + $0x40] sm:$0xff] }
 0x200   : > { %1902 = vmatpush.bf16.msra.mxu2 %v2987_v29  ;;  %v2982_v49 = vld [vmem:[%s3789_s20 + $0x80] sm:$0xff] }
 0x201   : > { %1915 = vmatpush.bf16.msra.mxu3 %v2995_v30  ;;  %v2990_v8 = vld [vmem:[%s3789_s20 + $0xc0] sm:$0xff] }
 0x202   : > { %1877 = vmatpush.bf16.msra.mxu0 %v2970_v31 }
 0x203   : > { %1890 = vmatpush.bf16.msra.mxu1 %v2978_v32 }
 0x204   : > { %1903 = vmatpush.bf16.msra.mxu2 %v2986_v34 }
 0x205   : > { %1916 = vmatpush.bf16.msra.mxu3 %v2994_v35  ;;  %v1602_v50 = vld.sshfl [vmem:[#allocation1] sm:$0xff pattern:$0x73625140]  ;;  %v1603_v51 = vld.sshfl [vmem:[#allocation1 + $0x8] sm:$0xff pattern:$0x73625140] }
 0x206   : > { %1878 = vmatpush.bf16.msra.mxu0 %v2969_v38  ;;  %v1604_v37 = vld.sshfl [vmem:[#allocation1 + $0x10] sm:$0xff pattern:$0x73625140]  ;;  %v1605_v52 = vld.sshfl [vmem:[#allocation1 + $0x18] sm:$0xff pattern:$0x73625140]  ;;  %v1610_v53 = vpack.c.bf16 %v1602_v50, %v1602_v50  ;;  %v1611_v54 = vpack.c.bf16 %v1603_v51, %v1603_v51 }
 0x207   : > { %1891 = vmatpush.bf16.msra.mxu1 %v2977_v39  ;;  %v1612_v55 = vpack.c.bf16 %v1604_v37, %v1604_v37  ;;  %v1613_v56 = vpack.c.bf16 %v1605_v52, %v1605_v52 }
 0x208   : > { %1904 = vmatpush.bf16.msra.mxu2 %v2985_v40 }
 0x209   : > { %1917 = vmatpush.bf16.msra.mxu3 %v2993_v41 }
 0x20a   : > { %1879 = vmatpush.bf16.msra.mxu0 %v2968_v42 }
 0x20b   : > { %1892 = vmatpush.bf16.msra.mxu1 %v2976_v43 }
 0x20c   : > { %1905 = vmatpush.bf16.msra.mxu2 %v2984_v44 }
 0x20d   : > { %1918 = vmatpush.bf16.msra.mxu3 %v2992_v45 }
 0x20e   : > { %1880 = vmatpush.bf16.msra.mxu0 %v2967_v4 }
 0x20f   : > { %1893 = vmatpush.bf16.msra.mxu1 %v2975_v46 }
 0x210   : > { %1906 = vmatpush.bf16.msra.mxu2 %v2983_v47 }
 0x211   : > { %1919 = vmatpush.bf16.msra.mxu3 %v2991_v48 }
 0x212   : > { %1881 = vmatpush.bf16.msra.mxu0 %v2966_v10 }
 0x213   : > { %1894 = vmatpush.bf16.msra.mxu1 %v2974_v3 }
 0x214   : > { %1907 = vmatpush.bf16.msra.mxu2 %v2982_v49 }
 0x215   : > { %1920 = vmatpush.bf16.msra.mxu3 %v2990_v8  ;;  %1882 = vmatmul.bf16.vlgmr.msra.gmra.mxu0 %v1610_v53 }
 0x216   : > { %1895 = vmatmul.bf16.vlgmr.msra.gmra.mxu1 %v1611_v54 }
 0x217   : > { %1908 = vmatmul.bf16.vlgmr.msra.gmra.mxu2 %v1612_v55 }
 0x218   : > { %1921 = vmatmul.bf16.vlgmr.msra.gmra.mxu3 %v1613_v56 }
 0x292   : > { %v1883_v58 = vpop.f32.mrf.mxu0 }
 0x293   : > { %v1896_v59 = vpop.f32.mrf.mxu1  ;;  %v1884_v60 = vadd.f32 %v3137_v57, %v1883_v58 }
 0x295   : > { %v1897_v61 = vadd.f32 %v1896_v59, %v1884_v60 }
 0x29a   : > { %v1909_v62 = vpop.f32.mrf.mxu2  ;;  %v1885_v1 = vpop.f32.mrf.mxu0 }
 0x29b   : > { %v1922_v63 = vpop.f32.mrf.mxu3  ;;  %v1910_v0 = vadd.f32 %v1909_v62, %v1897_v61  ;;  %v1898_v2 = vpop.f32.mrf.mxu1 }
 0x29d   : > { %v1923_v5 = vadd.f32 %v1922_v63, %v1910_v0 }
 0x29f   : > { %1926 = vst [vmem:[%s3797_s14] sm:$0x3] %v1923_v5 }
 0x2a2   : > { %v1911_v6 = vpop.f32.mrf.mxu2 }
 0x2a3   : > { %v1924_v7 = vpop.f32.mrf.mxu3 }
 0x2a4 PF: > { %s4227_s1 = sld [smem:[#allocation26_spill]]  ;;  %s1940_s17 = sshll.u32 %s3797_s14, 4  ;;  %s1941_s17 = int_to_ptr.vmem [resolvable:$true] %s1940_s17 }
 0x2a5   : > { %s4228_s24 = sld [smem:[#allocation37_spill]]  ;;  %s1928_s16 = scalar_lea.sflag [#allocation5], %s3756_s5 }
 0x2aa   : > { %s2832_s30 = sshll.u32 %s4227_s1, 1 }
 0x2ab   : > { %s4229_s3 = smov %s4228_s24  ;;  %s1938_s8 = scalar_lea.hbm %s4228_s24, %s2832_s30 }
 0x2ac   : > { %s1942_s25 = sshll.u32 %s1938_s8, 4  ;;  %s3368_s13 = scalar_lea.hbm %s4229_s3, 4  ;;  %s1943_s25 = int_to_ptr.hbm [resolvable:$true] %s1942_s25 }
 0x2ad   : > { %s3362_s27 = sshra.s32 %s1943_s25, 4  ;;  %s3363_s27 = int_to_ptr.hbm [resolvable:$true] %s3362_s27 }
 0x2ae   : > { %s3364_s12 = scalar_lea.hbm %s3363_s27, 2  ;;  %p3369_p3 = scmp.lt.s32.totalorder %s3363_s27, %s4229_s3 }
 0x2af   : > { %p3365_p8 = scmp.ne.s32.totalorder %s3363_s27, %s3364_s12  ;;  %p3370_p4 = scmp.lt.s32.totalorder %s3368_s13, %s3364_s12 }
 0x2b1   : > { %p3366_p11 = pnand %p3365_p8, %p3692_p13  ;;  %p3371_p5 = por %p3370_p4, %p3369_p3 }
 0x2b3   : > { %p3367_p0 = pneg %p3366_p11 }
 0x2b5   : > { %p3372_p6 = pnand %p3371_p5, %p3367_p0 }
 0x2b7   : > { %3375 = shalt.err (!%p3372_p6)
}
 0x2b8   : > { %3012 = dma.vmem_to_hbm [thread:$0]  (%p3692_p13), %s1941_s17, 32, %s1943_s25, %s1928_s16  }
 0x2b9 PF: > { %s4230_s5 = sld [smem:[#allocation23_spill]]  ;;  %p3041_p10 = scmp.ge.s32.totalorder %s3486_s11, 2 }
 0x2bb   : > { %p3037_p12 = pnand %p3041_p10, %p3696_p1 }
 0x2bd   : > { %p3038_p9 = pneg %p3037_p12 }
 0x2bf   : > { %s1954_s14 = sand.u32 1, %s4230_s5  }
 0x2c0   : > { %s1955_s21 = scalar_lea.sflag [#allocation5], %s1954_s14 }
 0x2c1   : > { %3441 = dma.done.wait (%p3038_p9), %s1955_s21, 32  }
 0x2c2   : > { %3443 = vsyncadd (%p3038_p9), %s1955_s21, 4294967264  ;;  %s32_s11 = sadd.s32 1, %s3486_s11   ;;  %s4232_s24 = sld [smem:[#allocation22_spill]] }
 0x2c3   : > { %p29_p2 = scmp.ge.s32.totalorder %s32_s11, 10   ;;  %s4233_s18 = sld [smem:[#allocation30_spill]] }
 0x2c4   : > { %s4234_s19 = sld [smem:[#allocation24_spill]]  ;;  %s4238_s25 = smov %s3454_s26 }
 0x2c5   : > { %s4235_s29 = sld [smem:[#allocation31_spill]]  ;;  %s4240_s27 = smov %s3462_s28 }
 0x2c6   : > { %s4236_s1 = sld [smem:[#allocation27_spill]]  ;;  %s4242_s30 = smov %s3478_s9 }
 0x2c7   : > { %s4237_s7 = sld [smem:[#allocation28_spill]]  ;;  %s4243_s8 = smov %s3482_s10 }
 0x2c9   : > { %s4239_s26 = smov %s4233_s18  ;;  %31 = sbr.rel (!%p29_p2) target bundleno = 21 (0x15), region = 173 }
 0x2ca   : > { %s4241_s28 = smov %s4234_s19 }
 0x2cc   : > { %s4244_s9 = smov %s4236_s1 }
 0x2cd   : > { %s4245_s10 = smov %s4237_s7 }
 0x2ce   :  { %1961 = vsyncpa [#allocation4], 1 }
 0x2cf   :  { %1963 = vsyncpa [#allocation4 + $0x1], 1 }
 0x2d0   :  { %1964 = vsyncpa [#allocation7], 1 }
 0x2d1   :  { %1966 = vsyncpa [#allocation7 + $0x1], 1 }
 0x2d2   :  { %1967 = vsyncpa [#allocation10], 1 }
 0x2d3   :  { %1969 = vsyncpa [#allocation10 + $0x1], 1 }
 0x2d4   :  { %1970 = vsyncpa [#allocation13], 1 }
 0x2d5   :  { %1972 = vsyncpa [#allocation13 + $0x1], 1 }
 0x2d6   :  { %1973 = vsyncpa [#allocation5], 1 }
 0x2d7   :  { %1975 = vsyncpa [#allocation5 + $0x1], 1 }

</bundles_post_ra>
